<compile_context>
chip_gen: v5e
topology: v5e:2x2
jax: 0.10.0
libtpu: 0.0.40
codegen_flags: <defaults>
</compile_context>

<pallas_src>
from functools import partial

import jax
import jax.numpy as jnp
from jax.experimental import pallas as pl
from jax.experimental.pallas import tpu as pltpu


def _layer_norm(y, w, b, eps=1e-5):
    # single-pass statistics: one reduction for mean, one for mean-of-squares
    m = jnp.mean(y, axis=-1, keepdims=True)
    ms = jnp.mean(y * y, axis=-1, keepdims=True)
    var = ms - m * m
    return (y - m) * jax.lax.rsqrt(var + eps) * w + b


def encoder_block_kernel(num_heads, tq,
                         x_ref,
                         wcq_ref, wck_ref, wcv_ref,
                         biq_ref, bik_ref, biv_ref,
                         wot_ref, bo_ref,
                         w1t_ref, b1_ref, w2t_ref, b2_ref,
                         lnw_ref, lnb_ref,
                         out_ref):
    f32 = jnp.float32
    bf = jnp.bfloat16

    E = x_ref.shape[2]
    hd = E // num_heads

    qi = pl.program_id(1)
    q_start = pl.multiple_of(qi * tq, tq)

    x_seq = x_ref[0]                                   # (S, E) f32 — full sequence (K/V source)
    xq = x_ref[0, pl.ds(q_start, tq), :]               # (TQ, E) f32 — query rows / residual 1

    xq_b = xq.astype(bf)
    xkv_b = x_seq.astype(bf)

    # Fused (pre-projection ∘ in_proj) matmuls; softmax scale pre-folded into Wcq / biq.
    q2 = jnp.dot(xq_b, wcq_ref[...], preferred_element_type=f32) + biq_ref[0, :]   # (TQ, E)
    k2 = jnp.dot(xkv_b, wck_ref[...], preferred_element_type=f32) + bik_ref[0, :]  # (S,  E)
    v2 = jnp.dot(xkv_b, wcv_ref[...], preferred_element_type=f32) + biv_ref[0, :]  # (S,  E)

    q2b = q2.astype(bf)
    k2b = k2.astype(bf)
    v2b = v2.astype(bf)
    wot = wot_ref[...]                                 # (E, E) bf16, rows indexed by attn feature

    # Per-head attention with out_proj fused into the accumulator (no lane concat).
    acc = jnp.zeros((tq, E), f32)
    for h in range(num_heads):
        sl = slice(h * hd, (h + 1) * hd)
        qh = q2b[:, sl]                                # (TQ, hd)
        kh = k2b[:, sl]                                # (S,  hd)
        vh = v2b[:, sl]                                # (S,  hd)
        s = jax.lax.dot_general(qh, kh, (((1,), (1,)), ((), ())),
                                preferred_element_type=f32)                  # (TQ, S)
        s = s - jnp.max(s, axis=-1, keepdims=True)
        p = jnp.exp(s)
        p = p * pl.reciprocal(jnp.sum(p, axis=-1, keepdims=True), approx=False)
        oh = jnp.dot(p.astype(bf), vh, preferred_element_type=f32)           # (TQ, hd)
        # attn @ Wo^T == sum_h head_h @ Wo^T[h*hd:(h+1)*hd, :]
        acc = acc + jnp.dot(oh.astype(bf), wot[sl, :], preferred_element_type=f32)
    attn = acc + bo_ref[0, :]

    lnw = lnw_ref[0, :]
    lnb = lnb_ref[0, :]

    # --- residual 1 + LayerNorm (f32) ---
    ln1 = _layer_norm(xq + attn, lnw, lnb)

    # --- feed-forward: Linear -> ReLU -> Linear ---
    h1 = jnp.dot(ln1.astype(bf), w1t_ref[...], preferred_element_type=f32) + b1_ref[0, :]
    h1 = jnp.maximum(h1, 0.0)
    ff = jnp.dot(h1.astype(bf), w2t_ref[...], preferred_element_type=f32) + b2_ref[0, :]

    # --- residual 2 + LayerNorm (same LN params, as in the module) ---
    out = _layer_norm(ff + ln1, lnw, lnb)
    out_ref[0] = out.astype(out_ref.dtype)


def prepare_params(params, num_heads):
    """One-time wrapper-side plumbing: compose linear maps, transpose, split, cast.

    q2 = (x @ Wq_pre^T) @ Wi_q^T + bi_q  ==  x @ (Wq_pre^T Wi_q^T) + bi_q   (exact composition)
    The softmax scale 1/sqrt(head_dim) is folded into the Q path (PyTorch scales q).
    The value path reuses key_projection, exactly as in the module's forward().
    """
    f32, bf = jnp.float32, jnp.bfloat16
    E = params["wq"].shape[0]
    hd = E // num_heads
    scale = 1.0 / float(hd) ** 0.5

    wq = params["wq"].astype(f32)
    wk = params["wk"].astype(f32)
    wi = params["wi"].astype(f32)                      # (3E, E) in_proj weight
    bi = params["bi"].astype(f32)                      # (1, 3E) in_proj bias

    wcq = (wq.T @ wi[0:E, :].T) * scale                # (E, E)
    wck = wk.T @ wi[E:2 * E, :].T
    wcv = wk.T @ wi[2 * E:3 * E, :].T                  # value reuses key projection

    return {
        "wcq": wcq.astype(bf), "wck": wck.astype(bf), "wcv": wcv.astype(bf),
        "biq": bi[:, 0:E] * scale, "bik": bi[:, E:2 * E], "biv": bi[:, 2 * E:3 * E],
        "woT": params["wo"].astype(f32).T.astype(bf),
        "bo": params["bo"].astype(f32),
        "w1T": params["w1"].astype(f32).T.astype(bf),  # (E, HID)
        "b1": params["b1"].astype(f32),
        "w2T": params["w2"].astype(f32).T.astype(bf),  # (HID, E)
        "b2": params["b2"].astype(f32),
        "lnw": params["lnw"].astype(f32),
        "lnb": params["lnb"].astype(f32),
    }


def transformer_encoder_block(x, params, num_heads, tq=None):
    B, S, E = x.shape
    assert E % num_heads == 0
    prep = prepare_params(params, num_heads)
    HID = prep["w1T"].shape[1]

    if tq is None:
        tq = min(S, 128)
    assert S % tq == 0 and tq % 8 == 0

    def const_map(b, qi):
        return (0, 0)

    in_specs = [
        pl.BlockSpec((1, S, E), lambda b, qi: (b, 0, 0)),  # x: full sequence (query tile sliced in-kernel)
        pl.BlockSpec((E, E), const_map),                   # fused Q weight (scale folded)
        pl.BlockSpec((E, E), const_map),                   # fused K weight
        pl.BlockSpec((E, E), const_map),                   # fused V weight
        pl.BlockSpec((1, E), const_map),                   # in_proj bias q (scaled)
        pl.BlockSpec((1, E), const_map),                   # in_proj bias k
        pl.BlockSpec((1, E), const_map),                   # in_proj bias v
        pl.BlockSpec((E, E), const_map),                   # Wo^T
        pl.BlockSpec((1, E), const_map),                   # out_proj bias
        pl.BlockSpec((E, HID), const_map),                 # W1^T
        pl.BlockSpec((1, HID), const_map),                 # b1
        pl.BlockSpec((HID, E), const_map),                 # W2^T
        pl.BlockSpec((1, E), const_map),                   # b2
        pl.BlockSpec((1, E), const_map),                   # LN weight
        pl.BlockSpec((1, E), const_map),                   # LN bias
    ]

    return pl.pallas_call(
        partial(encoder_block_kernel, num_heads, tq),
        out_shape=jax.ShapeDtypeStruct((B, S, E), x.dtype),
        grid_spec=pltpu.PrefetchScalarGridSpec(
            num_scalar_prefetch=0,
            grid=(B, S // tq),
            in_specs=in_specs,
            out_specs=pl.BlockSpec((1, tq, E), lambda b, qi: (b, qi, 0)),
        ),
        compiler_params=pltpu.CompilerParams(
            dimension_semantics=("parallel", "parallel"),
        ),
    )(x, prep["wcq"], prep["wck"], prep["wcv"],
      prep["biq"], prep["bik"], prep["biv"],
      prep["woT"], prep["bo"], prep["w1T"], prep["b1"],
      prep["w2T"], prep["b2"], prep["lnw"], prep["lnb"])


def reference_forward(x, prep, num_heads):
    """Pure-JAX reference matching the PyTorch forward semantics, mirroring the kernel's
    matmul precision (same composed bf16 weights, f32 accumulation; softmax / LayerNorm /
    residuals in f32)."""
    B, S, E = x.shape
    hd = E // num_heads
    f32, bf = jnp.float32, jnp.bfloat16
    hp = jax.lax.Precision.HIGHEST

    def mm(a, w_t):
        return jnp.einsum("...k,kn->...n", a.astype(bf), w_t,
                          precision=hp, preferred_element_type=f32)

    def ln(y):
        m = y.mean(-1, keepdims=True)
        v = ((y - m) ** 2).mean(-1, keepdims=True)
        return (y - m) / jnp.sqrt(v + 1e-5) * prep["lnw"][0] + prep["lnb"][0]

    q2 = mm(x, prep["wcq"]) + prep["biq"][0]
    k2 = mm(x, prep["wck"]) + prep["bik"][0]
    v2 = mm(x, prep["wcv"]) + prep["biv"][0]

    qh = q2.astype(bf).reshape(B, S, num_heads, hd).transpose(0, 2, 1, 3)
    kh = k2.astype(bf).reshape(B, S, num_heads, hd).transpose(0, 2, 1, 3)
    vh = v2.astype(bf).reshape(B, S, num_heads, hd).transpose(0, 2, 1, 3)
    sc = jnp.einsum("bhqd,bhkd->bhqk", qh, kh, precision=hp,
                    preferred_element_type=f32)
    sc = sc - sc.max(-1, keepdims=True)
    pr = jnp.exp(sc)
    pr = pr / pr.sum(-1, keepdims=True)
    ah = jnp.einsum("bhqk,bhkd->bhqd", pr.astype(bf), vh, precision=hp,
                    preferred_element_type=f32)
    ah = ah.transpose(0, 2, 1, 3).reshape(B, S, E)
    attn = mm(ah, prep["woT"]) + prep["bo"][0]

    l1 = ln(x + attn)
    h1 = jnp.maximum(mm(l1, prep["w1T"]) + prep["b1"][0], 0.0)
    ff = mm(h1, prep["w2T"]) + prep["b2"][0]
    return ln(ff + l1)


if __name__ == "__main__":
    B, S, E = 2, 32, 128          # lane-dense: E multiple of 128, S multiple of 8
    NUM_HEADS = 4
    HIDDEN = 256
    TQ = 16                       # grid (B, S//TQ) = (2, 2), both axes parallel

    key = jax.random.PRNGKey(0)
    ks = jax.random.split(key, 12)
    scale = 0.05
    f32, bf = jnp.float32, jnp.bfloat16

    params = {
        # matmul weights stored in bf16 (MXU-native); biases / LN params in f32
        "wq": (jax.random.normal(ks[0], (E, E), f32) * scale).astype(bf),
        "wk": (jax.random.normal(ks[1], (E, E), f32) * scale).astype(bf),
        # value_projection weight exists in the module but is unused by forward():
        "wv_unused": (jax.random.normal(ks[2], (E, E), f32) * scale).astype(bf),
        "wi": (jax.random.normal(ks[3], (3 * E, E), f32) * scale).astype(bf),
        "bi": jax.random.normal(ks[4], (1, 3 * E), f32) * scale,
        "wo": (jax.random.normal(ks[5], (E, E), f32) * scale).astype(bf),
        "bo": jax.random.normal(ks[6], (1, E), f32) * scale,
        "w1": (jax.random.normal(ks[7], (HIDDEN, E), f32) * scale).astype(bf),
        "b1": jax.random.normal(ks[8], (1, HIDDEN), f32) * scale,
        "w2": (jax.random.normal(ks[9], (E, HIDDEN), f32) * scale).astype(bf),
        "b2": jax.random.normal(ks[10], (1, E), f32) * scale,
        "lnw": jnp.ones((1, E), f32),
        "lnb": jnp.zeros((1, E), f32),
    }

    x = jax.random.normal(ks[11], (B, S, E), f32)

    out = transformer_encoder_block(x, params, NUM_HEADS, tq=TQ)
    out = jax.block_until_ready(out)

    ref = reference_forward(x, prepare_params(params, NUM_HEADS), NUM_HEADS)
    ref = jax.block_until_ready(ref)

    assert out.shape == (B, S, E)
    # tolerance sized for bf16 matmul operands (mirrored in the reference)
    assert jnp.allclose(out, ref, atol=2e-3, rtol=2e-3), "mismatch vs reference"

    print("KERNEL_OK")
</pallas_src>

<mosaic_0001>
module attributes {stable_mosaic.version = 11 : i64} {
  func.func @encoder_block_kernel(%arg0: i32, %arg1: i32, %arg2: memref<1x32x128xf32, #tpu.memory_space<vmem>>, %arg3: memref<128x128xbf16, #tpu.memory_space<vmem>>, %arg4: memref<128x128xbf16, #tpu.memory_space<vmem>>, %arg5: memref<128x128xbf16, #tpu.memory_space<vmem>>, %arg6: memref<1x128xf32, #tpu.memory_space<vmem>>, %arg7: memref<1x128xf32, #tpu.memory_space<vmem>>, %arg8: memref<1x128xf32, #tpu.memory_space<vmem>>, %arg9: memref<128x128xbf16, #tpu.memory_space<vmem>>, %arg10: memref<1x128xf32, #tpu.memory_space<vmem>>, %arg11: memref<128x256xbf16, #tpu.memory_space<vmem>>, %arg12: memref<1x256xf32, #tpu.memory_space<vmem>>, %arg13: memref<256x128xbf16, #tpu.memory_space<vmem>>, %arg14: memref<1x128xf32, #tpu.memory_space<vmem>>, %arg15: memref<1x128xf32, #tpu.memory_space<vmem>>, %arg16: memref<1x128xf32, #tpu.memory_space<vmem>>, %arg17: memref<1x16x128xf32, #tpu.memory_space<vmem>>) attributes {dimension_semantics = [#tpu.dimension_semantics<parallel>, #tpu.dimension_semantics<parallel>], iteration_bounds = array<i64: 2, 2>, scalar_prefetch = 0 : i64, scratch_operands = 0 : i64, tpu.core_type = #tpu.core_type<tc>, window_params = [{transform_indices = @transform_0, window_bounds = array<i64: 1, 32, 128>}, {pipeline_mode = #tpu.pipeline_mode<synchronous>, transform_indices = @transform_1, window_bounds = array<i64: 128, 128>}, {pipeline_mode = #tpu.pipeline_mode<synchronous>, transform_indices = @transform_2, window_bounds = array<i64: 128, 128>}, {pipeline_mode = #tpu.pipeline_mode<synchronous>, transform_indices = @transform_3, window_bounds = array<i64: 128, 128>}, {pipeline_mode = #tpu.pipeline_mode<synchronous>, transform_indices = @transform_4, window_bounds = array<i64: 1, 128>}, {pipeline_mode = #tpu.pipeline_mode<synchronous>, transform_indices = @transform_5, window_bounds = array<i64: 1, 128>}, {pipeline_mode = #tpu.pipeline_mode<synchronous>, transform_indices = @transform_6, window_bounds = array<i64: 1, 128>}, {pipeline_mode = #tpu.pipeline_mode<synchronous>, transform_indices = @transform_7, window_bounds = array<i64: 128, 128>}, {pipeline_mode = #tpu.pipeline_mode<synchronous>, transform_indices = @transform_8, window_bounds = array<i64: 1, 128>}, {pipeline_mode = #tpu.pipeline_mode<synchronous>, transform_indices = @transform_9, window_bounds = array<i64: 128, 256>}, {pipeline_mode = #tpu.pipeline_mode<synchronous>, transform_indices = @transform_10, window_bounds = array<i64: 1, 256>}, {pipeline_mode = #tpu.pipeline_mode<synchronous>, transform_indices = @transform_11, window_bounds = array<i64: 256, 128>}, {pipeline_mode = #tpu.pipeline_mode<synchronous>, transform_indices = @transform_12, window_bounds = array<i64: 1, 128>}, {pipeline_mode = #tpu.pipeline_mode<synchronous>, transform_indices = @transform_13, window_bounds = array<i64: 1, 128>}, {pipeline_mode = #tpu.pipeline_mode<synchronous>, transform_indices = @transform_14, window_bounds = array<i64: 1, 128>}, {transform_indices = @transform_15, window_bounds = array<i64: 1, 16, 128>}]} {
    %c16_i32 = arith.constant 16 : i32
    %0 = arith.muli %arg1, %c16_i32 : i32
    %1 = tpu.assume_multiple %0, 16 : i32
    %c0 = arith.constant 0 : index
    %c0_0 = arith.constant 0 : index
    %c0_1 = arith.constant 0 : index
    %2 = vector.load %arg2[%c0, %c0_0, %c0_1] : memref<1x32x128xf32, #tpu.memory_space<vmem>>, vector<1x32x128xf32>
    %3 = vector.shape_cast %2 : vector<1x32x128xf32> to vector<32x128xf32>
    %c0_2 = arith.constant 0 : index
    %4 = arith.index_cast %1 : i32 to index
    %c0_3 = arith.constant 0 : index
    %5 = vector.load %arg2[%c0_2, %4, %c0_3] : memref<1x32x128xf32, #tpu.memory_space<vmem>>, vector<1x16x128xf32>
    %6 = vector.shape_cast %5 : vector<1x16x128xf32> to vector<16x128xf32>
    %7 = arith.truncf %6 : vector<16x128xf32> to vector<16x128xbf16>
    %8 = arith.truncf %3 : vector<32x128xf32> to vector<32x128xbf16>
    %c0_4 = arith.constant 0 : index
    %c0_5 = arith.constant 0 : index
    %9 = vector.load %arg3[%c0_4, %c0_5] : memref<128x128xbf16, #tpu.memory_space<vmem>>, vector<128x128xbf16>
    %cst = arith.constant dense<0.000000e+00> : vector<16x128xf32>
    %10 = tpu.matmul %7, %9, %cst {dimension_numbers = #tpu.dot_dimension_numbers<[1], [0], [0], [1], [0, 0, 1, 1], [], []>} : vector<16x128xbf16>, vector<128x128xbf16>, vector<16x128xf32> -> vector<16x128xf32>
    %c0_6 = arith.constant 0 : index
    %c0_7 = arith.constant 0 : index
    %11 = vector.load %arg6[%c0_6, %c0_7] : memref<1x128xf32, #tpu.memory_space<vmem>>, vector<1x128xf32>
    %12 = vector.shape_cast %11 : vector<1x128xf32> to vector<128xf32>
    %13 = vector.shape_cast %12 : vector<128xf32> to vector<1x128xf32>
    %14 = vector.broadcast %13 : vector<1x128xf32> to vector<16x128xf32>
    %15 = arith.addf %10, %14 : vector<16x128xf32>
    %c0_8 = arith.constant 0 : index
    %c0_9 = arith.constant 0 : index
    %16 = vector.load %arg4[%c0_8, %c0_9] : memref<128x128xbf16, #tpu.memory_space<vmem>>, vector<128x128xbf16>
    %cst_10 = arith.constant dense<0.000000e+00> : vector<32x128xf32>
    %17 = tpu.matmul %8, %16, %cst_10 {dimension_numbers = #tpu.dot_dimension_numbers<[1], [0], [0], [1], [0, 0, 1, 1], [], []>} : vector<32x128xbf16>, vector<128x128xbf16>, vector<32x128xf32> -> vector<32x128xf32>
    %c0_11 = arith.constant 0 : index
    %c0_12 = arith.constant 0 : index
    %18 = vector.load %arg7[%c0_11, %c0_12] : memref<1x128xf32, #tpu.memory_space<vmem>>, vector<1x128xf32>
    %19 = vector.shape_cast %18 : vector<1x128xf32> to vector<128xf32>
    %20 = vector.shape_cast %19 : vector<128xf32> to vector<1x128xf32>
    %21 = vector.broadcast %20 : vector<1x128xf32> to vector<32x128xf32>
    %22 = arith.addf %17, %21 : vector<32x128xf32>
    %c0_13 = arith.constant 0 : index
    %c0_14 = arith.constant 0 : index
    %23 = vector.load %arg5[%c0_13, %c0_14] : memref<128x128xbf16, #tpu.memory_space<vmem>>, vector<128x128xbf16>
    %cst_15 = arith.constant dense<0.000000e+00> : vector<32x128xf32>
    %24 = tpu.matmul %8, %23, %cst_15 {dimension_numbers = #tpu.dot_dimension_numbers<[1], [0], [0], [1], [0, 0, 1, 1], [], []>} : vector<32x128xbf16>, vector<128x128xbf16>, vector<32x128xf32> -> vector<32x128xf32>
    %c0_16 = arith.constant 0 : index
    %c0_17 = arith.constant 0 : index
    %25 = vector.load %arg8[%c0_16, %c0_17] : memref<1x128xf32, #tpu.memory_space<vmem>>, vector<1x128xf32>
    %26 = vector.shape_cast %25 : vector<1x128xf32> to vector<128xf32>
    %27 = vector.shape_cast %26 : vector<128xf32> to vector<1x128xf32>
    %28 = vector.broadcast %27 : vector<1x128xf32> to vector<32x128xf32>
    %29 = arith.addf %24, %28 : vector<32x128xf32>
    %30 = arith.truncf %15 : vector<16x128xf32> to vector<16x128xbf16>
    %31 = arith.truncf %22 : vector<32x128xf32> to vector<32x128xbf16>
    %32 = arith.truncf %29 : vector<32x128xf32> to vector<32x128xbf16>
    %c0_18 = arith.constant 0 : index
    %c0_19 = arith.constant 0 : index
    %33 = vector.load %arg9[%c0_18, %c0_19] : memref<128x128xbf16, #tpu.memory_space<vmem>>, vector<128x128xbf16>
    %cst_20 = arith.constant 0.000000e+00 : f32
    %34 = vector.broadcast %cst_20 : f32 to vector<16x128xf32>
    %35 = vector.extract_strided_slice %30 {offsets = [0, 0], sizes = [16, 32], strides = [1, 1]} : vector<16x128xbf16> to vector<16x32xbf16>
    %36 = vector.extract_strided_slice %31 {offsets = [0, 0], sizes = [32, 32], strides = [1, 1]} : vector<32x128xbf16> to vector<32x32xbf16>
    %37 = vector.extract_strided_slice %32 {offsets = [0, 0], sizes = [32, 32], strides = [1, 1]} : vector<32x128xbf16> to vector<32x32xbf16>
    %cst_21 = arith.constant dense<0.000000e+00> : vector<16x32xf32>
    %38 = tpu.matmul %35, %36, %cst_21 {dimension_numbers = #tpu.dot_dimension_numbers<[1], [1], [0], [0], [0, 0, 1, 0], [], []>} : vector<16x32xbf16>, vector<32x32xbf16>, vector<16x32xf32> -> vector<16x32xf32>
    %cst_22 = arith.constant dense<0xFF800000> : vector<16xf32>
    %39 = vector.multi_reduction <maximumf>, %38, %cst_22 [1] : vector<16x32xf32> to vector<16xf32>
    %40 = vector.shape_cast %39 : vector<16xf32> to vector<16x1xf32>
    %41 = vector.broadcast %40 : vector<16x1xf32> to vector<16x32xf32>
    %42 = arith.subf %38, %41 : vector<16x32xf32>
    %43 = math.exp %42 : vector<16x32xf32>
    %cst_23 = arith.constant dense<0.000000e+00> : vector<16xf32>
    %44 = vector.multi_reduction <add>, %43, %cst_23 [1] : vector<16x32xf32> to vector<16xf32>
    %45 = vector.shape_cast %44 : vector<16xf32> to vector<16x1xf32>
    %46 = tpu.reciprocal %45 : vector<16x1xf32> -> vector<16x1xf32>
    %47 = vector.broadcast %46 : vector<16x1xf32> to vector<16x32xf32>
    %48 = arith.mulf %43, %47 : vector<16x32xf32>
    %49 = arith.truncf %48 : vector<16x32xf32> to vector<16x32xbf16>
    %cst_24 = arith.constant dense<0.000000e+00> : vector<16x32xf32>
    %50 = tpu.matmul %49, %37, %cst_24 {dimension_numbers = #tpu.dot_dimension_numbers<[1], [0], [0], [1], [0, 0, 1, 1], [], []>} : vector<16x32xbf16>, vector<32x32xbf16>, vector<16x32xf32> -> vector<16x32xf32>
    %51 = arith.truncf %50 : vector<16x32xf32> to vector<16x32xbf16>
    %52 = vector.extract_strided_slice %33 {offsets = [0, 0], sizes = [32, 128], strides = [1, 1]} : vector<128x128xbf16> to vector<32x128xbf16>
    %cst_25 = arith.constant dense<0.000000e+00> : vector<16x128xf32>
    %53 = tpu.matmul %51, %52, %cst_25 {dimension_numbers = #tpu.dot_dimension_numbers<[1], [0], [0], [1], [0, 0, 1, 1], [], []>} : vector<16x32xbf16>, vector<32x128xbf16>, vector<16x128xf32> -> vector<16x128xf32>
    %54 = arith.addf %34, %53 : vector<16x128xf32>
    %55 = vector.extract_strided_slice %30 {offsets = [0, 32], sizes = [16, 32], strides = [1, 1]} : vector<16x128xbf16> to vector<16x32xbf16>
    %56 = vector.extract_strided_slice %31 {offsets = [0, 32], sizes = [32, 32], strides = [1, 1]} : vector<32x128xbf16> to vector<32x32xbf16>
    %57 = vector.extract_strided_slice %32 {offsets = [0, 32], sizes = [32, 32], strides = [1, 1]} : vector<32x128xbf16> to vector<32x32xbf16>
    %cst_26 = arith.constant dense<0.000000e+00> : vector<16x32xf32>
    %58 = tpu.matmul %55, %56, %cst_26 {dimension_numbers = #tpu.dot_dimension_numbers<[1], [1], [0], [0], [0, 0, 1, 0], [], []>} : vector<16x32xbf16>, vector<32x32xbf16>, vector<16x32xf32> -> vector<16x32xf32>
    %cst_27 = arith.constant dense<0xFF800000> : vector<16xf32>
    %59 = vector.multi_reduction <maximumf>, %58, %cst_27 [1] : vector<16x32xf32> to vector<16xf32>
    %60 = vector.shape_cast %59 : vector<16xf32> to vector<16x1xf32>
    %61 = vector.broadcast %60 : vector<16x1xf32> to vector<16x32xf32>
    %62 = arith.subf %58, %61 : vector<16x32xf32>
    %63 = math.exp %62 : vector<16x32xf32>
    %cst_28 = arith.constant dense<0.000000e+00> : vector<16xf32>
    %64 = vector.multi_reduction <add>, %63, %cst_28 [1] : vector<16x32xf32> to vector<16xf32>
    %65 = vector.shape_cast %64 : vector<16xf32> to vector<16x1xf32>
    %66 = tpu.reciprocal %65 : vector<16x1xf32> -> vector<16x1xf32>
    %67 = vector.broadcast %66 : vector<16x1xf32> to vector<16x32xf32>
    %68 = arith.mulf %63, %67 : vector<16x32xf32>
    %69 = arith.truncf %68 : vector<16x32xf32> to vector<16x32xbf16>
    %cst_29 = arith.constant dense<0.000000e+00> : vector<16x32xf32>
    %70 = tpu.matmul %69, %57, %cst_29 {dimension_numbers = #tpu.dot_dimension_numbers<[1], [0], [0], [1], [0, 0, 1, 1], [], []>} : vector<16x32xbf16>, vector<32x32xbf16>, vector<16x32xf32> -> vector<16x32xf32>
    %71 = arith.truncf %70 : vector<16x32xf32> to vector<16x32xbf16>
    %72 = vector.extract_strided_slice %33 {offsets = [32, 0], sizes = [32, 128], strides = [1, 1]} : vector<128x128xbf16> to vector<32x128xbf16>
    %cst_30 = arith.constant dense<0.000000e+00> : vector<16x128xf32>
    %73 = tpu.matmul %71, %72, %cst_30 {dimension_numbers = #tpu.dot_dimension_numbers<[1], [0], [0], [1], [0, 0, 1, 1], [], []>} : vector<16x32xbf16>, vector<32x128xbf16>, vector<16x128xf32> -> vector<16x128xf32>
    %74 = arith.addf %54, %73 : vector<16x128xf32>
    %75 = vector.extract_strided_slice %30 {offsets = [0, 64], sizes = [16, 32], strides = [1, 1]} : vector<16x128xbf16> to vector<16x32xbf16>
    %76 = vector.extract_strided_slice %31 {offsets = [0, 64], sizes = [32, 32], strides = [1, 1]} : vector<32x128xbf16> to vector<32x32xbf16>
    %77 = vector.extract_strided_slice %32 {offsets = [0, 64], sizes = [32, 32], strides = [1, 1]} : vector<32x128xbf16> to vector<32x32xbf16>
    %cst_31 = arith.constant dense<0.000000e+00> : vector<16x32xf32>
    %78 = tpu.matmul %75, %76, %cst_31 {dimension_numbers = #tpu.dot_dimension_numbers<[1], [1], [0], [0], [0, 0, 1, 0], [], []>} : vector<16x32xbf16>, vector<32x32xbf16>, vector<16x32xf32> -> vector<16x32xf32>
    %cst_32 = arith.constant dense<0xFF800000> : vector<16xf32>
    %79 = vector.multi_reduction <maximumf>, %78, %cst_32 [1] : vector<16x32xf32> to vector<16xf32>
    %80 = vector.shape_cast %79 : vector<16xf32> to vector<16x1xf32>
    %81 = vector.broadcast %80 : vector<16x1xf32> to vector<16x32xf32>
    %82 = arith.subf %78, %81 : vector<16x32xf32>
    %83 = math.exp %82 : vector<16x32xf32>
    %cst_33 = arith.constant dense<0.000000e+00> : vector<16xf32>
    %84 = vector.multi_reduction <add>, %83, %cst_33 [1] : vector<16x32xf32> to vector<16xf32>
    %85 = vector.shape_cast %84 : vector<16xf32> to vector<16x1xf32>
    %86 = tpu.reciprocal %85 : vector<16x1xf32> -> vector<16x1xf32>
    %87 = vector.broadcast %86 : vector<16x1xf32> to vector<16x32xf32>
    %88 = arith.mulf %83, %87 : vector<16x32xf32>
    %89 = arith.truncf %88 : vector<16x32xf32> to vector<16x32xbf16>
    %cst_34 = arith.constant dense<0.000000e+00> : vector<16x32xf32>
    %90 = tpu.matmul %89, %77, %cst_34 {dimension_numbers = #tpu.dot_dimension_numbers<[1], [0], [0], [1], [0, 0, 1, 1], [], []>} : vector<16x32xbf16>, vector<32x32xbf16>, vector<16x32xf32> -> vector<16x32xf32>
    %91 = arith.truncf %90 : vector<16x32xf32> to vector<16x32xbf16>
    %92 = vector.extract_strided_slice %33 {offsets = [64, 0], sizes = [32, 128], strides = [1, 1]} : vector<128x128xbf16> to vector<32x128xbf16>
    %cst_35 = arith.constant dense<0.000000e+00> : vector<16x128xf32>
    %93 = tpu.matmul %91, %92, %cst_35 {dimension_numbers = #tpu.dot_dimension_numbers<[1], [0], [0], [1], [0, 0, 1, 1], [], []>} : vector<16x32xbf16>, vector<32x128xbf16>, vector<16x128xf32> -> vector<16x128xf32>
    %94 = arith.addf %74, %93 : vector<16x128xf32>
    %95 = vector.extract_strided_slice %30 {offsets = [0, 96], sizes = [16, 32], strides = [1, 1]} : vector<16x128xbf16> to vector<16x32xbf16>
    %96 = vector.extract_strided_slice %31 {offsets = [0, 96], sizes = [32, 32], strides = [1, 1]} : vector<32x128xbf16> to vector<32x32xbf16>
    %97 = vector.extract_strided_slice %32 {offsets = [0, 96], sizes = [32, 32], strides = [1, 1]} : vector<32x128xbf16> to vector<32x32xbf16>
    %cst_36 = arith.constant dense<0.000000e+00> : vector<16x32xf32>
    %98 = tpu.matmul %95, %96, %cst_36 {dimension_numbers = #tpu.dot_dimension_numbers<[1], [1], [0], [0], [0, 0, 1, 0], [], []>} : vector<16x32xbf16>, vector<32x32xbf16>, vector<16x32xf32> -> vector<16x32xf32>
    %cst_37 = arith.constant dense<0xFF800000> : vector<16xf32>
    %99 = vector.multi_reduction <maximumf>, %98, %cst_37 [1] : vector<16x32xf32> to vector<16xf32>
    %100 = vector.shape_cast %99 : vector<16xf32> to vector<16x1xf32>
    %101 = vector.broadcast %100 : vector<16x1xf32> to vector<16x32xf32>
    %102 = arith.subf %98, %101 : vector<16x32xf32>
    %103 = math.exp %102 : vector<16x32xf32>
    %cst_38 = arith.constant dense<0.000000e+00> : vector<16xf32>
    %104 = vector.multi_reduction <add>, %103, %cst_38 [1] : vector<16x32xf32> to vector<16xf32>
    %105 = vector.shape_cast %104 : vector<16xf32> to vector<16x1xf32>
    %106 = tpu.reciprocal %105 : vector<16x1xf32> -> vector<16x1xf32>
    %107 = vector.broadcast %106 : vector<16x1xf32> to vector<16x32xf32>
    %108 = arith.mulf %103, %107 : vector<16x32xf32>
    %109 = arith.truncf %108 : vector<16x32xf32> to vector<16x32xbf16>
    %cst_39 = arith.constant dense<0.000000e+00> : vector<16x32xf32>
    %110 = tpu.matmul %109, %97, %cst_39 {dimension_numbers = #tpu.dot_dimension_numbers<[1], [0], [0], [1], [0, 0, 1, 1], [], []>} : vector<16x32xbf16>, vector<32x32xbf16>, vector<16x32xf32> -> vector<16x32xf32>
    %111 = arith.truncf %110 : vector<16x32xf32> to vector<16x32xbf16>
    %112 = vector.extract_strided_slice %33 {offsets = [96, 0], sizes = [32, 128], strides = [1, 1]} : vector<128x128xbf16> to vector<32x128xbf16>
    %cst_40 = arith.constant dense<0.000000e+00> : vector<16x128xf32>
    %113 = tpu.matmul %111, %112, %cst_40 {dimension_numbers = #tpu.dot_dimension_numbers<[1], [0], [0], [1], [0, 0, 1, 1], [], []>} : vector<16x32xbf16>, vector<32x128xbf16>, vector<16x128xf32> -> vector<16x128xf32>
    %114 = arith.addf %94, %113 : vector<16x128xf32>
    %c0_41 = arith.constant 0 : index
    %c0_42 = arith.constant 0 : index
    %115 = vector.load %arg10[%c0_41, %c0_42] : memref<1x128xf32, #tpu.memory_space<vmem>>, vector<1x128xf32>
    %116 = vector.shape_cast %115 : vector<1x128xf32> to vector<128xf32>
    %117 = vector.shape_cast %116 : vector<128xf32> to vector<1x128xf32>
    %118 = vector.broadcast %117 : vector<1x128xf32> to vector<16x128xf32>
    %119 = arith.addf %114, %118 : vector<16x128xf32>
    %c0_43 = arith.constant 0 : index
    %c0_44 = arith.constant 0 : index
    %120 = vector.load %arg15[%c0_43, %c0_44] : memref<1x128xf32, #tpu.memory_space<vmem>>, vector<1x128xf32>
    %121 = vector.shape_cast %120 : vector<1x128xf32> to vector<128xf32>
    %c0_45 = arith.constant 0 : index
    %c0_46 = arith.constant 0 : index
    %122 = vector.load %arg16[%c0_45, %c0_46] : memref<1x128xf32, #tpu.memory_space<vmem>>, vector<1x128xf32>
    %123 = vector.shape_cast %122 : vector<1x128xf32> to vector<128xf32>
    %124 = arith.addf %6, %119 : vector<16x128xf32>
    %cst_47 = arith.constant dense<0.000000e+00> : vector<16xf32>
    %125 = vector.multi_reduction <add>, %124, %cst_47 [1] : vector<16x128xf32> to vector<16xf32>
    %126 = vector.shape_cast %125 : vector<16xf32> to vector<16x1xf32>
    %cst_48 = arith.constant 1.280000e+02 : f32
    %127 = vector.broadcast %cst_48 : f32 to vector<16x1xf32>
    %128 = arith.divf %126, %127 : vector<16x1xf32>
    %129 = arith.mulf %124, %124 : vector<16x128xf32>
    %cst_49 = arith.constant dense<0.000000e+00> : vector<16xf32>
    %130 = vector.multi_reduction <add>, %129, %cst_49 [1] : vector<16x128xf32> to vector<16xf32>
    %131 = vector.shape_cast %130 : vector<16xf32> to vector<16x1xf32>
    %cst_50 = arith.constant 1.280000e+02 : f32
    %132 = vector.broadcast %cst_50 : f32 to vector<16x1xf32>
    %133 = arith.divf %131, %132 : vector<16x1xf32>
    %134 = arith.mulf %128, %128 : vector<16x1xf32>
    %135 = arith.subf %133, %134 : vector<16x1xf32>
    %136 = vector.broadcast %128 : vector<16x1xf32> to vector<16x128xf32>
    %137 = arith.subf %124, %136 : vector<16x128xf32>
    %cst_51 = arith.constant 9.99999974E-6 : f32
    %138 = vector.broadcast %cst_51 : f32 to vector<16x1xf32>
    %139 = arith.addf %135, %138 : vector<16x1xf32>
    %140 = math.rsqrt %139 : vector<16x1xf32>
    %141 = vector.broadcast %140 : vector<16x1xf32> to vector<16x128xf32>
    %142 = arith.mulf %137, %141 : vector<16x128xf32>
    %143 = vector.shape_cast %121 : vector<128xf32> to vector<1x128xf32>
    %144 = vector.broadcast %143 : vector<1x128xf32> to vector<16x128xf32>
    %145 = arith.mulf %142, %144 : vector<16x128xf32>
    %146 = vector.shape_cast %123 : vector<128xf32> to vector<1x128xf32>
    %147 = vector.broadcast %146 : vector<1x128xf32> to vector<16x128xf32>
    %148 = arith.addf %145, %147 : vector<16x128xf32>
    %149 = arith.truncf %148 : vector<16x128xf32> to vector<16x128xbf16>
    %c0_52 = arith.constant 0 : index
    %c0_53 = arith.constant 0 : index
    %150 = vector.load %arg11[%c0_52, %c0_53] : memref<128x256xbf16, #tpu.memory_space<vmem>>, vector<128x256xbf16>
    %cst_54 = arith.constant dense<0.000000e+00> : vector<16x256xf32>
    %151 = tpu.matmul %149, %150, %cst_54 {dimension_numbers = #tpu.dot_dimension_numbers<[1], [0], [0], [1], [0, 0, 1, 1], [], []>} : vector<16x128xbf16>, vector<128x256xbf16>, vector<16x256xf32> -> vector<16x256xf32>
    %c0_55 = arith.constant 0 : index
    %c0_56 = arith.constant 0 : index
    %152 = vector.load %arg12[%c0_55, %c0_56] : memref<1x256xf32, #tpu.memory_space<vmem>>, vector<1x256xf32>
    %153 = vector.shape_cast %152 : vector<1x256xf32> to vector<256xf32>
    %154 = vector.shape_cast %153 : vector<256xf32> to vector<1x256xf32>
    %155 = vector.broadcast %154 : vector<1x256xf32> to vector<16x256xf32>
    %156 = arith.addf %151, %155 : vector<16x256xf32>
    %cst_57 = arith.constant 0.000000e+00 : f32
    %157 = vector.broadcast %cst_57 : f32 to vector<16x256xf32>
    %158 = arith.maximumf %156, %157 : vector<16x256xf32>
    %159 = arith.truncf %158 : vector<16x256xf32> to vector<16x256xbf16>
    %c0_58 = arith.constant 0 : index
    %c0_59 = arith.constant 0 : index
    %160 = vector.load %arg13[%c0_58, %c0_59] : memref<256x128xbf16, #tpu.memory_space<vmem>>, vector<256x128xbf16>
    %cst_60 = arith.constant dense<0.000000e+00> : vector<16x128xf32>
    %161 = tpu.matmul %159, %160, %cst_60 {dimension_numbers = #tpu.dot_dimension_numbers<[1], [0], [0], [1], [0, 0, 1, 1], [], []>} : vector<16x256xbf16>, vector<256x128xbf16>, vector<16x128xf32> -> vector<16x128xf32>
    %c0_61 = arith.constant 0 : index
    %c0_62 = arith.constant 0 : index
    %162 = vector.load %arg14[%c0_61, %c0_62] : memref<1x128xf32, #tpu.memory_space<vmem>>, vector<1x128xf32>
    %163 = vector.shape_cast %162 : vector<1x128xf32> to vector<128xf32>
    %164 = vector.shape_cast %163 : vector<128xf32> to vector<1x128xf32>
    %165 = vector.broadcast %164 : vector<1x128xf32> to vector<16x128xf32>
    %166 = arith.addf %161, %165 : vector<16x128xf32>
    %167 = arith.addf %166, %148 : vector<16x128xf32>
    %cst_63 = arith.constant dense<0.000000e+00> : vector<16xf32>
    %168 = vector.multi_reduction <add>, %167, %cst_63 [1] : vector<16x128xf32> to vector<16xf32>
    %169 = vector.shape_cast %168 : vector<16xf32> to vector<16x1xf32>
    %cst_64 = arith.constant 1.280000e+02 : f32
    %170 = vector.broadcast %cst_64 : f32 to vector<16x1xf32>
    %171 = arith.divf %169, %170 : vector<16x1xf32>
    %172 = arith.mulf %167, %167 : vector<16x128xf32>
    %cst_65 = arith.constant dense<0.000000e+00> : vector<16xf32>
    %173 = vector.multi_reduction <add>, %172, %cst_65 [1] : vector<16x128xf32> to vector<16xf32>
    %174 = vector.shape_cast %173 : vector<16xf32> to vector<16x1xf32>
    %cst_66 = arith.constant 1.280000e+02 : f32
    %175 = vector.broadcast %cst_66 : f32 to vector<16x1xf32>
    %176 = arith.divf %174, %175 : vector<16x1xf32>
    %177 = arith.mulf %171, %171 : vector<16x1xf32>
    %178 = arith.subf %176, %177 : vector<16x1xf32>
    %179 = vector.broadcast %171 : vector<16x1xf32> to vector<16x128xf32>
    %180 = arith.subf %167, %179 : vector<16x128xf32>
    %cst_67 = arith.constant 9.99999974E-6 : f32
    %181 = vector.broadcast %cst_67 : f32 to vector<16x1xf32>
    %182 = arith.addf %178, %181 : vector<16x1xf32>
    %183 = math.rsqrt %182 : vector<16x1xf32>
    %184 = vector.broadcast %183 : vector<16x1xf32> to vector<16x128xf32>
    %185 = arith.mulf %180, %184 : vector<16x128xf32>
    %186 = vector.shape_cast %121 : vector<128xf32> to vector<1x128xf32>
    %187 = vector.broadcast %186 : vector<1x128xf32> to vector<16x128xf32>
    %188 = arith.mulf %185, %187 : vector<16x128xf32>
    %189 = vector.shape_cast %123 : vector<128xf32> to vector<1x128xf32>
    %190 = vector.broadcast %189 : vector<1x128xf32> to vector<16x128xf32>
    %191 = arith.addf %188, %190 : vector<16x128xf32>
    %c0_68 = arith.constant 0 : index
    %c0_69 = arith.constant 0 : index
    %c0_70 = arith.constant 0 : index
    %192 = vector.load %arg17[%c0_68, %c0_69, %c0_70] : memref<1x16x128xf32, #tpu.memory_space<vmem>>, vector<1x16x128xf32>
    %193 = vector.shape_cast %192 : vector<1x16x128xf32> to vector<16x128xf32>
    %194 = vector.shape_cast %191 : vector<16x128xf32> to vector<1x16x128xf32>
    tpu.vector_store %arg17[%c0_68, %c0_69, %c0_70], %194 {strides = array<i32>} : memref<1x16x128xf32, #tpu.memory_space<vmem>>, vector<1x16x128xf32>,
    return
  }
  func.func @transform_0(%arg0: i32, %arg1: i32) -> (i32, i32, i32) {
    %c0_i32 = arith.constant 0 : i32
    %c0_i32_0 = arith.constant 0 : i32
    %c0_i32_1 = arith.constant 0 : i32
    return %arg0, %c0_i32, %c0_i32_0 : i32, i32, i32
  }
  func.func @transform_1(%arg0: i32, %arg1: i32) -> (i32, i32) {
    %c0_i32 = arith.constant 0 : i32
    %c0_i32_0 = arith.constant 0 : i32
    %c0_i32_1 = arith.constant 0 : i32
    return %c0_i32, %c0_i32_0 : i32, i32
  }
  func.func @transform_2(%arg0: i32, %arg1: i32) -> (i32, i32) {
    %c0_i32 = arith.constant 0 : i32
    %c0_i32_0 = arith.constant 0 : i32
    %c0_i32_1 = arith.constant 0 : i32
    return %c0_i32, %c0_i32_0 : i32, i32
  }
  func.func @transform_3(%arg0: i32, %arg1: i32) -> (i32, i32) {
    %c0_i32 = arith.constant 0 : i32
    %c0_i32_0 = arith.constant 0 : i32
    %c0_i32_1 = arith.constant 0 : i32
    return %c0_i32, %c0_i32_0 : i32, i32
  }
  func.func @transform_4(%arg0: i32, %arg1: i32) -> (i32, i32) {
    %c0_i32 = arith.constant 0 : i32
    %c0_i32_0 = arith.constant 0 : i32
    %c0_i32_1 = arith.constant 0 : i32
    return %c0_i32, %c0_i32_0 : i32, i32
  }
  func.func @transform_5(%arg0: i32, %arg1: i32) -> (i32, i32) {
    %c0_i32 = arith.constant 0 : i32
    %c0_i32_0 = arith.constant 0 : i32
    %c0_i32_1 = arith.constant 0 : i32
    return %c0_i32, %c0_i32_0 : i32, i32
  }
  func.func @transform_6(%arg0: i32, %arg1: i32) -> (i32, i32) {
    %c0_i32 = arith.constant 0 : i32
    %c0_i32_0 = arith.constant 0 : i32
    %c0_i32_1 = arith.constant 0 : i32
    return %c0_i32, %c0_i32_0 : i32, i32
  }
  func.func @transform_7(%arg0: i32, %arg1: i32) -> (i32, i32) {
    %c0_i32 = arith.constant 0 : i32
    %c0_i32_0 = arith.constant 0 : i32
    %c0_i32_1 = arith.constant 0 : i32
    return %c0_i32, %c0_i32_0 : i32, i32
  }
  func.func @transform_8(%arg0: i32, %arg1: i32) -> (i32, i32) {
    %c0_i32 = arith.constant 0 : i32
    %c0_i32_0 = arith.constant 0 : i32
    %c0_i32_1 = arith.constant 0 : i32
    return %c0_i32, %c0_i32_0 : i32, i32
  }
  func.func @transform_9(%arg0: i32, %arg1: i32) -> (i32, i32) {
    %c0_i32 = arith.constant 0 : i32
    %c0_i32_0 = arith.constant 0 : i32
    %c0_i32_1 = arith.constant 0 : i32
    return %c0_i32, %c0_i32_0 : i32, i32
  }
  func.func @transform_10(%arg0: i32, %arg1: i32) -> (i32, i32) {
    %c0_i32 = arith.constant 0 : i32
    %c0_i32_0 = arith.constant 0 : i32
    %c0_i32_1 = arith.constant 0 : i32
    return %c0_i32, %c0_i32_0 : i32, i32
  }
  func.func @transform_11(%arg0: i32, %arg1: i32) -> (i32, i32) {
    %c0_i32 = arith.constant 0 : i32
    %c0_i32_0 = arith.constant 0 : i32
    %c0_i32_1 = arith.constant 0 : i32
    return %c0_i32, %c0_i32_0 : i32, i32
  }
  func.func @transform_12(%arg0: i32, %arg1: i32) -> (i32, i32) {
    %c0_i32 = arith.constant 0 : i32
    %c0_i32_0 = arith.constant 0 : i32
    %c0_i32_1 = arith.constant 0 : i32
    return %c0_i32, %c0_i32_0 : i32, i32
  }
  func.func @transform_13(%arg0: i32, %arg1: i32) -> (i32, i32) {
    %c0_i32 = arith.constant 0 : i32
    %c0_i32_0 = arith.constant 0 : i32
    %c0_i32_1 = arith.constant 0 : i32
    return %c0_i32, %c0_i32_0 : i32, i32
  }
  func.func @transform_14(%arg0: i32, %arg1: i32) -> (i32, i32) {
    %c0_i32 = arith.constant 0 : i32
    %c0_i32_0 = arith.constant 0 : i32
    %c0_i32_1 = arith.constant 0 : i32
    return %c0_i32, %c0_i32_0 : i32, i32
  }
  func.func @transform_15(%arg0: i32, %arg1: i32) -> (i32, i32, i32) {
    %c0_i32 = arith.constant 0 : i32
    %c0_i32_0 = arith.constant 0 : i32
    return %arg0, %arg1, %c0_i32 : i32, i32, i32
  }
}

</mosaic_0001>

<bundles_post_ra>
// kernel: tpu_custom_call.1
= control target key start
LH: loop header
LB: loop body
LE: loop exit
PB: predicated region body
PF: predicated region fallthrough
CT: control target
= control target key end

     0   :  { %s3565_s0 = inlined_call_operand.hbm [shape: f32[2,32,128], index: 0, kind: input, shape index: {}]   ;;  %s3566_s1 = inlined_call_operand.hbm [shape: bf16[128,128], index: 1, kind: input, shape index: {}]   ;;  %s3567_s2 = inlined_call_operand.hbm [shape: bf16[128,128], index: 2, kind: input, shape index: {}]   ;;  %s3568_s3 = inlined_call_operand.hbm [shape: bf16[128,128], index: 3, kind: input, shape index: {}]   ;;  %s3569_s4 = inlined_call_operand.vmem [shape: f32[1,128], index: 4, kind: input, shape index: {}]   ;;  %s3570_s5 = inlined_call_operand.vmem [shape: f32[1,128], index: 5, kind: input, shape index: {}]   ;;  %s3571_s6 = inlined_call_operand.vmem [shape: f32[1,128], index: 6, kind: input, shape index: {}]   ;;  %s3572_s7 = inlined_call_operand.hbm [shape: bf16[128,128], index: 7, kind: input, shape index: {}]   ;;  %s3573_s8 = inlined_call_operand.vmem [shape: f32[1,128], index: 8, kind: input, shape index: {}]   ;;  %s3574_s9 = inlined_call_operand.hbm [shape: bf16[128,256], index: 9, kind: input, shape index: {}]   ;;  %s3575_s10 = inlined_call_operand.vmem [shape: f32[1,256], index: 10, kind: input, shape index: {}]   ;;  %s3576_s11 = inlined_call_operand.hbm [shape: bf16[256,128], index: 11, kind: input, shape index: {}]   ;;  %s3577_s12 = inlined_call_operand.vmem [shape: f32[1,128], index: 12, kind: input, shape index: {}]   ;;  %s3578_s13 = inlined_call_operand.vmem [shape: f32[1,128], index: 13, kind: input, shape index: {}]   ;;  %s3579_s14 = inlined_call_operand.vmem [shape: f32[1,128], index: 14, kind: input, shape index: {}]   ;;  %s3580_s15 = inlined_call_operand.hbm [shape: f32[2,32,128], index: 15, kind: output, shape index: {}]  }
   0x1   :  { %3591 = sst [smem:[#allocation23_spill]] %s3566_s1 }
   0x2   :  { %3592 = sst [smem:[#allocation24_spill]] %s3567_s2 }
   0x3   :  { %3593 = sst [smem:[#allocation25_spill]] %s3568_s3 }
   0x4   :  { %3594 = sst [smem:[#allocation26_spill]] %s3569_s4 }
   0x5   :  { %3595 = sst [smem:[#allocation27_spill]] %s3570_s5 }
   0x6   :  { %3596 = sst [smem:[#allocation28_spill]] %s3571_s6 }
   0x7   :  { %3597 = sst [smem:[#allocation29_spill]] %s3572_s7 }
   0x8   :  { %3598 = sst [smem:[#allocation30_spill]] %s3573_s8 }
   0x9   :  { %3599 = sst [smem:[#allocation31_spill]] %s3574_s9 }
   0xa   :  { %3600 = sst [smem:[#allocation32_spill]] %s3575_s10 }
   0xb   :  { %3601 = sst [smem:[#allocation33_spill]] %s3576_s11 }
   0xc   :  { %3602 = sst [smem:[#allocation34_spill]] %s3577_s12 }
   0xd   :  { %3603 = sst [smem:[#allocation35_spill]] %s3578_s13 }
   0xe   :  { %3604 = sst [smem:[#allocation36_spill]] %s3579_s14 }
   0xf   :  { %3605 = sst [smem:[#allocation37_spill]] %s3580_s15 }
  0x10   :  { %20 = vsyncpa [#allocation3], 0 }
  0x11   :  { %22 = vsyncpa [#allocation3 + $0x1], 0 }
  0x12   :  { %23 = vsyncpa [#allocation6], 0 }
  0x13   :  { %24 = vsyncpa [#allocation9], 0 }
  0x14   :  { %25 = vsyncpa [#allocation12], 0 }
  0x15   :  { %26 = vsyncpa [#allocation4], 0 }
  0x16   :  { %28 = vsyncpa [#allocation4 + $0x1], 0  ;;  %s3077_s18 = smov 0   ;;  %s3079_s19 = smov 0  }
  0x17   :  { %s3081_s20 = smov 0   ;;  %s3083_s21 = smov 0  }
  0x18   :  { %s3085_s22 = smov 0   ;;  %s3087_s23 = smov 0  }
  0x19   :  { %s3089_s24 = smov 0   ;;  %s3091_s25 = smov 0  }
  0x1a   :  { %s3093_s26 = smov 0   ;;  %s3095_s27 = smov 0  }
  0x1b   :  { %s3097_s28 = smov 0  }
  0x1c LB: > { %3606 = sst [smem:[#allocation20_spill]] %s2967_s25  ;;  %s3582_s29 = sadd.s32 4294967295, %s2979_s28   ;;  %s2979_s28 = sphi %s3097_s28, %s34_s28   ;;  %s2975_s27 = sphi %s3095_s27, %s3648_s27   ;;  %s2971_s26 = sphi %s3093_s26, %s3647_s26   ;;  %s2967_s25 = sphi %s3091_s25, %s3646_s25   ;;  %s2963_s24 = sphi %s3089_s24, %s3645_s24   ;;  %s2959_s23 = sphi %s3087_s23, %s3644_s23   ;;  %s2955_s22 = sphi %s3085_s22, %s3643_s22   ;;  %s2951_s21 = sphi %s3083_s21, %s3642_s21   ;;  %s2947_s20 = sphi %s3081_s20, %s3641_s20   ;;  %s2943_s19 = sphi %s3079_s19, %s3640_s19   ;;  %s2939_s18 = sphi %s3077_s18, %s3639_s18  }
  0x1d   : > { %p2053_p0 = scmp.ge.s32.totalorder %s2979_s28, 1  ;;  %p3136_p1 = scmp.eq.s32.totalorder %s3582_s29, 0 }
  0x1e   : > { %p399_p2 = scmp.lt.s32.totalorder %s2979_s28, 5  ;;  %s3608_s1 = sld [smem:[#allocation23_spill]] }
  0x1f   : > { %s3607_s30 = scalar_select %p3136_p1, 1, 0 }
  0x20   : > { %p3144_p3 = pnand %p2053_p0, %p399_p2  ;;  %s2981_s12 = smov [#allocation5]  }
  0x21   : > { %s412_s10 = sshll.u32 %s2981_s12, 4  ;;  %s3611_s3 = sld [smem:[#allocation25_spill]]  ;;  %s413_s10 = int_to_ptr.vmem [resolvable:$true] %s412_s10 }
  0x22   : > { %p2441_p4 = pneg %p3144_p3  ;;  %s2982_s17 = smov [#allocation8]  }
  0x23   : > { %s3583_s8 = smov 64   ;;  %s2984_s12 = smov 4  }
  0x24   : > { %s410_s15 = sshll.u32 %s3608_s1, 4  ;;  %p3152_p5 = pnand %p2441_p4, %p3136_p1  ;;  %s411_s15 = int_to_ptr.hbm [resolvable:$true] %s410_s15 }
  0x25   : > { %s440_s1 = sshll.u32 %s2982_s17, 4  ;;  %s3612_s9 = sld [smem:[#allocation31_spill]]  ;;  %s441_s1 = int_to_ptr.vmem [resolvable:$true] %s440_s1 }
  0x26   : > { %2444 = dma.hbm_to_vmem [thread:$0]  (!%p3152_p5), %s411_s15, 1024, %s413_s10, [#allocation6], %s3583_s8, %s3583_s8, %s2984_s12  }
  0x27   : > { %s438_s16 = sshll.u32 %s3611_s3, 4  ;;  %s2985_s14 = smov [#allocation11]   ;;  %s439_s16 = int_to_ptr.hbm [resolvable:$true] %s438_s16 }
  0x28   : > { %2450 = dma.hbm_to_vmem [thread:$0]  (!%p3152_p5), %s439_s16, 1024, %s441_s1, [#allocation9], %s3583_s8, %s3583_s8, %s2984_s12  }
  0x29   : > { %s480_s17 = sshll.u32 %s2985_s14, 4  ;;  %s3585_s3 = smov 128   ;;  %s481_s17 = int_to_ptr.vmem [resolvable:$true] %s480_s17 }
  0x2a   : > { %s3588_s5 = smov 8   ;;  %s3613_s2 = sld [smem:[#allocation24_spill]] }
  0x2b   : > { %s478_s13 = sshll.u32 %s3612_s9, 4  ;;  %s2988_s15 = smov [#allocation7]   ;;  %s479_s13 = int_to_ptr.hbm [resolvable:$true] %s478_s13 }
  0x2c   : > { %2456 = dma.hbm_to_vmem [thread:$0]  (!%p3152_p5), %s479_s13, 2048, %s481_s17, [#allocation12], %s3585_s3, %s3585_s3, %s3588_s5  }
  0x2d   : > { %s426_s1 = sshll.u32 %s2988_s15, 4  ;;  %s3614_s7 = sld [smem:[#allocation29_spill]]  ;;  %s427_s1 = int_to_ptr.vmem [resolvable:$true] %s426_s1 }
  0x2e   : > { %s3615_s9 = smov 64   ;;  %s2989_s13 = smov [#allocation10]  }
  0x2f   : > { %s463_s17 = sshll.u32 %s2989_s13, 4  ;;  %s3616_s11 = sld [smem:[#allocation33_spill]]  ;;  %s464_s17 = int_to_ptr.vmem [resolvable:$true] %s463_s17 }
  0x30   : > { %s424_s10 = sshll.u32 %s3613_s2, 4  ;;  %s3617_s3 = sadd.s32 4294967295, %s2979_s28   ;;  %s425_s10 = int_to_ptr.hbm [resolvable:$true] %s424_s10 }
  0x31   : > { %2447 = dma.hbm_to_vmem [thread:$0]  (!%p3152_p5), %s425_s10, 1024, %s427_s1, [#allocation6], %s3615_s9, %s3615_s9, %s2984_s12  }
  0x32   : > { %p3193_p6 = scmp.eq.s32.totalorder %s3617_s3, 3  ;;  %s2990_s10 = smov [#allocation13]  }
  0x33   : > { %s461_s8 = sshll.u32 %s3614_s7, 4  ;;  %s497_s1 = sshll.u32 %s2990_s10, 4  ;;  %s462_s8 = int_to_ptr.hbm [resolvable:$true] %s461_s8  ;;  %s498_s1 = int_to_ptr.vmem [resolvable:$true] %s497_s1 }
  0x34   : > { %2453 = dma.hbm_to_vmem [thread:$0]  (!%p3152_p5), %s462_s8, 1024, %s464_s17, [#allocation9], %s3615_s9, %s3615_s9, %s2984_s12  }
  0x35   : > { %s495_s15 = sshll.u32 %s3616_s11, 4  ;;  %s2052_s3 = sadd.s32 4294967294, %s2979_s28   ;;  %s496_s15 = int_to_ptr.hbm [resolvable:$true] %s495_s15 }
  0x36   : > { %2459 = dma.hbm_to_vmem [thread:$0]  (!%p3152_p5), %s496_s15, 2048, %s498_s1, [#allocation12], %s3615_s9, %s3615_s9, %s2984_s12  }
  0x37   : > { %s43_s14 = sadd.s32 1, %s2971_s26  ;;  %s46_s8 = sadd.s32 1, %s2975_s27 }
  0x38   : > { %p44_p7 = scmp.ge.s32.totalorder %s43_s14, 2  ;;  %s53_s13 = sadd.s32 1, %s2959_s23 }
  0x39   : > { %p60_p8 = scmp.ne.s32.totalorder %s2959_s23, %s2955_s22  ;;  %p61_p9 = scmp.eq.s32.totalorder %s2979_s28, 0 }
  0x3a   : > { %s3650_s14 = smov (%p44_p7, %s43_s14), 0  ;;  %s3652_s8 = smov (!%p44_p7, %s46_s8), %s2975_s27 }
  0x3b   : > { %3619 = sst [smem:[#allocation21_spill]] %s3650_s14  ;;  %p66_p10 = scmp.ne.s32.totalorder %s2955_s22, %s2951_s21 }
  0x3c   : > { %p48_p11 = scmp.ge.s32.totalorder %s3652_s8, 2  ;;  %s371_s9 = ssub.s32 %s2971_s26, %s3650_s14 }
  0x3d   : > { %p3223_p12 = por %p3136_p1, %p66_p10  ;;  %s375_s12 = sadd.s32 1, %s2947_s20 }
  0x3e   : > { %s3654_s8 = smov (%p48_p11, %s3652_s8), 0  ;;  %p385_p13 = scmp.ne.s32.totalorder %s2947_s20, %s2943_s19 }
  0x3f   : > { %3621 = sst [smem:[#allocation22_spill]] %s3654_s8  ;;  %p391_p0 = scmp.ne.s32.totalorder %s2943_s19, %s2939_s18 }
  0x40   : > { %s50_s21 = ssub.s32 %s2975_s27, %s3654_s8  ;;  %p392_p2 = scmp.eq.s32.totalorder %s2052_s3, 3 }
  0x41   : > { %p51_p4 = scmp.eq.s32.totalorder %s50_s21, 0  ;;  %s372_s17 = sor.u32 %s371_s9, %s50_s21 }
  0x42   : > { %p373_p5 = scmp.eq.s32.totalorder %s372_s17, 0  ;;  %p3238_p7 = por %p3193_p6, %p385_p13 }
  0x43   : > { %s3243_s6 = scalar_select %p51_p4, %s2959_s23, %s53_s13  }
  0x44   : > { %s3246_s15 = scalar_select %p373_p5, %s2947_s20, %s375_s12  }
  0x45   : > { %p62_p10 = por %p61_p9, %p60_p8  ;;  %p3253_p11 = por %p392_p2, %p391_p0 }
  0x46   : > { %s520_s1 = sand.u32 1, %s2959_s23   ;;  %s2348_s3 = sshll.u32 %s2975_s27, 5 }
  0x47   : > { %p2474_p1 = scmp.lt.s32.totalorder %s2979_s28, 4  ;;  %s2061_s9 = sshll.u32 %s520_s1, 5 }
  0x48   : > { %s529_s17 = scalar_lea.hbm %s3565_s0, %s2348_s3  ;;  %s524_s13 = scalar_lea.vmem [#allocation2], %s2061_s9 }
  0x49   : > { %s530_s5 = sshll.u32 %s529_s17, 4  ;;  %s532_s2 = sshll.u32 %s524_s13, 4  ;;  %s531_s5 = int_to_ptr.hbm [resolvable:$true] %s530_s5  ;;  %s533_s2 = int_to_ptr.vmem [resolvable:$true] %s532_s2 }
  0x4a   : > { %p2461_p6 = pnand %p2474_p1, %p62_p10  ;;  %s521_s12 = scalar_lea.sflag [#allocation3], %s520_s1 }
  0x4b   : > { %s3624_s7 = smov 8   ;;  %s3625_s11 = smov 128  }
  0x4c   : > { %2463 = dma.hbm_to_vmem [thread:$0]  (!%p2461_p6), %s531_s5, 512, %s533_s2, %s521_s12, %s3625_s11, %s3625_s11, %s3624_s7  }
  0x4d   : > { %544 = sbr.rel (%p3144_p3) target bundleno = 2154 (0x86a), region = 80  ;;  %s546_s8 = sand.u32 (!%p3144_p3), 1, %s2955_s22  }
  0x4e   : > { %s2065_s14 = sshll.u32 (!%p3144_p3), %s546_s8, 5  ;;  %s547_s16 = scalar_lea.sflag (!%p3144_p3), [#allocation3], %s546_s8 }
  0x4f   : > { %s3269_s3 = scalar_lea.vmem (!%p3144_p3), [#allocation2], %s2065_s14 }
  0x52   : > { %2918 = dma.done.wait (%p3223_p12), %s547_s16, 512  }
  0x53   : > { %2920 = vsyncadd (%p3223_p12), %s547_s16, 4294966784  ;;  %p3626_p1 = scmp.ne.s32.totalorder %s3607_s30, 0 }
  0x55   : > { %2922 = dma.done.wait (%p3626_p1), [#allocation6], 2048  }
  0x56   : > { %2924 = vsyncadd (%p3626_p1), [#allocation6], 4294965248 }
  0x57   : > { %2926 = dma.done.wait (%p3626_p1), [#allocation9], 2048  }
  0x58   : > { %2928 = vsyncadd (%p3626_p1), [#allocation9], 4294965248 }
  0x59   : > { %2930 = dma.done.wait (%p3626_p1), [#allocation12], 4096  }
  0x5a   : > { %2932 = vsyncadd (%p3626_p1), [#allocation12], 4294963200  ;;  %v2364_v0 = vld [vmem:[#allocation7 + $0x38] sm:$0xff]  ;;  %v2363_v1 = vld [vmem:[#allocation7 + $0x30] sm:$0xff]  ;;  %s2073_s2 = sshll.u32 %s2963_s24, 4  ;;  %s3627_s25 = sld [smem:[#allocation27_spill]] }
  0x5b   : > { %791 = vmatpush.bf16.msra.mxu1 %v2364_v0  ;;  %v2356_v2 = vld [vmem:[#allocation5 + $0x38] sm:$0xff]  ;;  %v2355_v3 = vld [vmem:[#allocation5 + $0x30] sm:$0xff]  ;;  %v2362_v4 = vld [vmem:[#allocation7 + $0x28] sm:$0xff]  ;;  %s635_s5 = scalar_lea.vmem %s3269_s3, %s2073_s2 [#allocation2]  ;;  %s3628_s8 = sld [smem:[#allocation26_spill]]  ;;  %vm938_vm0 = vcmask 261120  }
  0x5c   : > { %709 = vmatpush.bf16.msra.mxu0 %v2356_v2  ;;  %v2354_v5 = vld [vmem:[#allocation5 + $0x28] sm:$0xff]  ;;  %v2361_v6 = vld [vmem:[#allocation7 + $0x20] sm:$0xff]  ;;  %v2360_v8 = vld [vmem:[#allocation7 + $0x18] sm:$0xff]  ;;  %s2991_s29 = smov 96   ;;  %s2992_s1 = smov 64  }
  0x5d   : > { %v2353_v7 = vld [vmem:[#allocation5 + $0x20] sm:$0xff]  ;;  %v2352_v9 = vld [vmem:[#allocation5 + $0x18] sm:$0xff]  ;;  %v2359_v10 = vld [vmem:[#allocation7 + $0x10] sm:$0xff]  ;;  %s2993_s9 = smov 32   ;;  %s3629_s13 = sld [smem:[#allocation28_spill]] }
  0x5e   : > { %v2351_v11 = vld [vmem:[#allocation5 + $0x10] sm:$0xff]  ;;  %v2358_v12 = vld [vmem:[#allocation7 + $0x8] sm:$0xff]  ;;  %v2357_v14 = vld [vmem:[#allocation7] sm:$0xff]  ;;  %s3631_s7 = sld [smem:[#allocation35_spill]]  ;;  %s625_s16 = sand.u32 1, %s2943_s19  }
  0x5f   : > { %792 = vmatpush.bf16.msra.mxu1 %v2363_v1  ;;  %v2350_v13 = vld [vmem:[#allocation5 + $0x8] sm:$0xff]  ;;  %v631_v15 = vld [vmem:[%s3269_s3] sm:$0xff]  ;;  %v633_v22 = vld [vmem:[%s3269_s3 + $0x10] sm:$0xff]  ;;  %s3632_s30 = sld [smem:[#allocation36_spill]]  ;;  %s2072_s2 = sshll.u32 %s625_s16, 4 }
  0x60   : > { %710 = vmatpush.bf16.msra.mxu0 %v2355_v3  ;;  %v632_v16 = vld [vmem:[%s3269_s3 + $0x8] sm:$0xff]  ;;  %v2349_v17 = vld [vmem:[#allocation5] sm:$0xff]  ;;  %v634_v23 = vld [vmem:[%s3269_s3 + $0x18] sm:$0xff]  ;;  %s3630_s3 = sld [smem:[#allocation30_spill]] }
  0x61   : > { %v3291_v18 = vld [vmem:[%s635_s5] sm:$0xff]  ;;  %v3293_v19 = vld [vmem:[%s635_s5 + $0x8] sm:$0xff]  ;;  %v3295_v20 = vpack.c.bf16 %v632_v16, %v631_v15  ;;  %v3302_v24 = vpack.c.bf16 %v634_v23, %v633_v22  ;;  %v2372_v63 = vld [vmem:[#allocation8 + $0x38] sm:$0xff]  ;;  %s3634_s21 = sld [smem:[#allocation34_spill]] }
  0x62   : > { %v638_v21 = vpack.c.bf16 %v3293_v19, %v3291_v18  ;;  %v2586_v28 = vld [vmem:[%s3627_s25] ss:$0 sm:$0xff]  ;;  %878 = vmatpush.bf16.msra.mxu2 %v2372_v63  ;;  %v2371_v1 = vld [vmem:[#allocation8 + $0x30] sm:$0xff]  ;;  %v2370_v3 = vld [vmem:[#allocation8 + $0x28] sm:$0xff]  ;;  %s3635_s17 = sld [smem:[#allocation20_spill]] }
  0x63   : > { %793 = vmatpush.bf16.msra.mxu1 %v2362_v4  ;;  %v2587_v41 = vld [vmem:[%s3628_s8] ss:$0 sm:$0xff]  ;;  %s3636_s11 = sld [smem:[#allocation37_spill]] }
  0x64   : > { %711 = vmatpush.bf16.msra.mxu0 %v2354_v5  ;;  %v2369_v4 = vld [vmem:[#allocation8 + $0x20] sm:$0xff]  ;;  %v2368_v5 = vld [vmem:[#allocation8 + $0x18] sm:$0xff] }
  0x66   : > { %879 = vmatpush.bf16.msra.mxu2 %v2371_v1 }
  0x67   : > { %794 = vmatpush.bf16.msra.mxu1 %v2361_v6  ;;  %v2367_v6 = vld [vmem:[#allocation8 + $0x10] sm:$0xff] }
  0x68   : > { %712 = vmatpush.bf16.msra.mxu0 %v2353_v7  ;;  %v2366_v7 = vld [vmem:[#allocation8 + $0x8] sm:$0xff]  ;;  %s2344_s12 = sshll.u32 %s3635_s17, 2 }
  0x6a   : > { %880 = vmatpush.bf16.msra.mxu2 %v2370_v3 }
  0x6b   : > { %795 = vmatpush.bf16.msra.mxu1 %v2360_v8  ;;  %v2365_v8 = vld [vmem:[#allocation8] sm:$0xff] }
  0x6c   : > { %713 = vmatpush.bf16.msra.mxu0 %v2352_v9 }
  0x6e   : > { %881 = vmatpush.bf16.msra.mxu2 %v2369_v4 }
  0x6f   : > { %796 = vmatpush.bf16.msra.mxu1 %v2359_v10 }
  0x70   : > { %714 = vmatpush.bf16.msra.mxu0 %v2351_v11 }
  0x72   : > { %882 = vmatpush.bf16.msra.mxu2 %v2368_v5 }
  0x73   : > { %797 = vmatpush.bf16.msra.mxu1 %v2358_v12 }
  0x74   : > { %715 = vmatpush.bf16.msra.mxu0 %v2350_v13 }
  0x76   : > { %883 = vmatpush.bf16.msra.mxu2 %v2367_v6 }
  0x77   : > { %798 = vmatpush.bf16.msra.mxu1 %v2357_v14 }
  0x78   : > { %716 = vmatpush.bf16.msra.mxu0 %v2349_v17 }
  0x7a   : > { %799 = vmatmul.bf16.vlgmr.msra.gmra.mxu1 %v3295_v20  ;;  %884 = vmatpush.bf16.msra.mxu2 %v2366_v7 }
  0x7b   : > { %717 = vmatmul.bf16.vlgmr.msra.gmra.mxu0 %v638_v21 }
  0x7e   : > { %885 = vmatpush.bf16.msra.mxu2 %v2365_v8 }
  0x81   : > { %886 = vmatmul.bf16.vlgmr.msra.gmra.mxu2 %v3295_v20 }
  0x8a   : > { %804 = vmatmul.bf16.gmra.mxu1 %v3302_v24 }
  0x91   : > { %891 = vmatmul.bf16.gmra.mxu2 %v3302_v24 }
  0xf7   : > { %v800_v25 = vpop.f32.mrf.mxu1 }
  0xf8   : > { %v718_v30 = vpop.f32.mrf.mxu0  ;;  %v801_v35 = vadd.f32 %v2586_v28, %v800_v25 }
  0xf9   : > { %v719_v47 = vadd.f32 %v2587_v41, %v718_v30 }
  0xfa   : > { %v899_v40 = vpack.c.bf16 %v801_v35, %v801_v35 }
  0xfb   : > { %v897_v50 = vpack.c.bf16 %v719_v47, %v719_v47 }
  0xfc   : > { %v932_v46 = vunpack.c.l.b16 %v899_v40 }
  0xfd   : > { %v925_v53 = vunpack.c.l.b16 %v897_v50  ;;  %v2373_v50 = vld [vmem:[#allocation10] sm:$0xff] }
  0xff   : > { %v802_v26 = vpop.f32.mrf.mxu1 }
 0x100   : > { %v803_v32 = vadd.f32 %v2586_v28, %v802_v26  ;;  %v720_v43 = vpop.f32.mrf.mxu0 }
 0x101   : > { %v721_v48 = vadd.f32 %v2587_v41, %v720_v43 }
 0x102   : > { %v900_v37 = vpack.c.bf16 %v803_v32, %v803_v32 }
 0x103   : > { %v898_v51 = vpack.c.bf16 %v721_v48, %v721_v48 }
 0x104   : > { %v933_v44 = vunpack.c.l.b16 %v900_v37 }
 0x105   : > { %v926_v54 = vunpack.c.l.b16 %v898_v51 }
 0x106   : > { %v936_v49 = vpack.c.b16 %v933_v44, %v932_v46 }
 0x107   : > { %v805_v27 = vpop.f32.mrf.mxu1  ;;  %v927_v55 = vpack.c.b16 %v926_v54, %v925_v53 }
 0x108   : > { %v806_v29 = vadd.f32 %v2586_v28, %v805_v27  ;;  %v943_v52 = vsel %vm938_vm0, %v936_v49, 0 }
 0x10a   : > { %v901_v33 = vpack.c.bf16 %v806_v29, %v806_v29  ;;  %v887_v29 = vpop.f32.mrf.mxu2 }
 0x10c   : > { %v934_v38 = vunpack.c.l.b16 %v901_v33 }
 0x10f   : > { %v807_v31 = vpop.f32.mrf.mxu1 }
 0x110   : > { %v808_v34 = vadd.f32 %v2586_v28, %v807_v31  ;;  %v2588_v31 = vld [vmem:[%s3629_s13] ss:$0 sm:$0xff]  ;;  %s2343_s13 = sshll.u32 %s2963_s24, 1 }
 0x112   : > { %v902_v36 = vpack.c.bf16 %v808_v34, %v808_v34  ;;  %v889_v30 = vpop.f32.mrf.mxu2  ;;  %v888_v34 = vadd.f32 %v2588_v31, %v887_v29 }
 0x113   : > { %v890_v35 = vadd.f32 %v2588_v31, %v889_v30 }
 0x114   : > { %v935_v39 = vunpack.c.l.b16 %v902_v36 }
 0x116   : > { %v3311_v42 = vpack.c.b16 %v935_v39, %v934_v38  ;;  %v903_v38 = vpack.c.bf16 %v888_v34, %v888_v34  ;;  %v904_v39 = vpack.c.bf16 %v890_v35, %v890_v35 }
 0x118   : > { %1045 = vrot.lane.b32.xlu2 %v3311_v42, %s2991_s29  ;;  %v946_v45 = vsel %vm938_vm0, %v3311_v42, 0  ;;  %v1015_v44 = vunpack.c.l.b16 %v903_v38 }
 0x119   : > { %954 = vmatpush.bf16.xpose.msra.mxu3 %v946_v45  ;;  %v1016_v45 = vunpack.c.l.b16 %v904_v39 }
 0x11a   : > { %v892_v32 = vpop.f32.mrf.mxu2 }
 0x11b   : > { %v893_v33 = vadd.f32 %v2588_v31, %v892_v32  ;;  %v3360_v48 = vpack.c.b16 %v1016_v45, %v1015_v44 }
 0x11d   : > { %v905_v36 = vpack.c.bf16 %v893_v33, %v893_v33 }
 0x11f   : > { %v1017_v41 = vunpack.c.l.b16 %v905_v36 }
 0x120   : > { %1043 = vrot.lane.b32.xlu2 %v936_v49, %s2991_s29 }
 0x121   : > { %955 = vmatpush.bf16.xpose.msra.mxu3 %v943_v52 }
 0x122   : > { %v894_v37 = vpop.f32.mrf.mxu2 }
 0x123   : > { %v895_v40 = vadd.f32 %v2588_v31, %v894_v37 }
 0x125   : > { %v906_v43 = vpack.c.bf16 %v895_v40, %v895_v40 }
 0x127   : > { %v1018_v46 = vunpack.c.l.b16 %v906_v43 }
 0x128   : > { %1041 = vrot.lane.b32.xlu2 %v927_v55, %s2991_s29  ;;  %2170 = vmatmul.msk.bf16.vlgmr.msra.gmra.mxu3 %vm938_vm0, %v927_v55 }
 0x129   : > { %v3358_v47 = vpack.c.b16 %v1018_v46, %v1017_v41 }
 0x12b   : > { %1032 = vmatpush.bf16.msrb.mxu3 %v3358_v47 }
 0x12f   : > { %1033 = vmatpush.bf16.msrb.mxu3 %v3360_v48 }
 0x130   : > { %1203 = vrot.lane.b32.xlu2 %v936_v49, %s2992_s1 }
 0x138   : > { %1336 = vrot.lane.b32.xlu2 %v936_v49, %s2993_s9  ;;  %v2374_v49 = vld [vmem:[#allocation10 + $0x8] sm:$0xff] }
 0x139   : > { %1193 = vmatpush.bf16.msrb.mxu1 %v2374_v49 }
 0x13d   : > { %1194 = vmatpush.bf16.msrb.mxu1 %v2373_v50 }
 0x140   : > { %1334 = vrot.lane.b32.xlu2 %v927_v55, %s2993_s9 }
 0x172   : > { %v1046_v56 = vpop.permute.xlu2 %1045 }
 0x173   : > { %v1054_v57 = vsel %vm938_vm0, %v1046_v56, 0 }
 0x174   : > { %1062 = vmatpush.bf16.xpose.msrb.mxu0 %v1054_v57 }
 0x17a   : > { %v1044_v58 = vpop.permute.xlu2 %1043 }
 0x17b   : > { %v1051_v59 = vsel %vm938_vm0, %v1044_v58, 0 }
 0x17c   : > { %1063 = vmatpush.bf16.xpose.msrb.mxu0 %v1051_v59 }
 0x182   : > { %v1042_v60 = vpop.permute.xlu2 %1041 }
 0x183   : > { %2172 = vmatmul.msk.bf16.vlgmr.msrb.gmra.mxu0 %vm938_vm0, %v1042_v60 }
 0x18a   : > { %v1204_v26 = vpop.permute.xlu2 %1203 }
 0x18b   : > { %v1211_v27 = vsel %vm938_vm0, %v1204_v26, 0 }
 0x1ab   : > { %v957_v61 = vpop.f32.mrf.mxu3 }
 0x1ac   : > { %v962_v62 = vsel %vm938_vm0, %v957_v61, -inf }
 0x1ad   : > { %963 = vmax.xlane.f32.xlu0 %v962_v62 }
 0x1b3   : > { %v959_v0 = vpop.f32.mrf.mxu3 }
 0x1b4   : > { %v965_v2 = vsel %vm938_vm0, %v959_v0, -inf }
 0x1b5   : > { %966 = vmax.xlane.f32.xlu0 %v965_v2 }
 0x1c9   : > { %1205 = vrot.lane.b32.xlu0 %v3311_v42, %s2992_s1 }
 0x1d1   : > { %1201 = vrot.lane.b32.xlu0 %v927_v55, %s2992_s1 }
 0x200   : > { %v3334_v9 = vpop.f32.mrf.mxu0 }
 0x208   : > { %v3336_v10 = vpop.f32.mrf.mxu0 }
 0x209   : > { %v1073_v11 = vsel %vm938_vm0, %v3336_v10, -inf }
 0x20a   : > { %1074 = vmax.xlane.f32.xlu0 %v1073_v11 }
 0x220   : > { %v964_v12 = vpop.xlane.xlu0 %963 }
 0x221   : > { %v968_v13 = vsub.f32 %v957_v61, %v964_v12 }
 0x223   : > { %v970_v14 = vmul.f32 1.442695, %v968_v13 }
 0x225   : > { %2593 = vpow2.f32 %v970_v14 }
 0x228   : > { %v967_v15 = vpop.xlane.xlu0 %966 }
 0x229   : > { %v969_v16 = vsub.f32 %v959_v0, %v967_v15 }
 0x22b   : > { %v3340_v17 = vpop.eup %2593  ;;  %v972_v21 = vmul.f32 1.442695, %v969_v16 }
 0x22c   : > { %v974_v20 = vsel %vm938_vm0, %v3340_v17, 0.0 }
 0x22d   : > { %2595 = vpow2.f32 %v972_v21  ;;  %975 = vadd.xlane.f32.xlu1 %v974_v20  ;;  %v1337_v21 = vpop.permute.xlu2 %1336 }
 0x233   : > { %v3344_v22 = vpop.eup %2595 }
 0x234   : > { %v977_v23 = vsel %vm938_vm0, %v3344_v22, 0.0 }
 0x235   : > { %978 = vadd.xlane.f32.xlu1 %v977_v23  ;;  %v1344_v23 = vsel %vm938_vm0, %v1337_v21, 0  ;;  %v1335_v31 = vpop.permute.xlu2 %1334 }
 0x23b   : > { %v1206_v24 = vpop.permute.xlu0 %1205 }
 0x23c   : > { %v1214_v25 = vsel %vm938_vm0, %v1206_v24, 0 }
 0x23d   : > { %1222 = vmatpush.bf16.xpose.msrb.mxu2 %v1214_v25 }
 0x243   : > { %v1202_v28 = vpop.permute.xlu0 %1201 }
 0x245   : > { %1223 = vmatpush.bf16.xpose.msrb.mxu2 %v1211_v27 }
 0x24c   : > { %2192 = vmatmul.msk.bf16.vlgmr.msrb.gmra.mxu2 %vm938_vm0, %v1202_v28 }
 0x24e   : > { %1338 = vrot.lane.b32.xlu1 %v3311_v42, %s2993_s9  ;;  %v1070_v42 = vsel %vm938_vm0, %v3334_v9, -inf }
 0x278   : > { %1071 = vmax.xlane.f32.xlu1 %v1070_v42 }
 0x27d   : > { %v1075_v16 = vpop.xlane.xlu0 %1074 }
 0x27e   : > { %v1077_v20 = vsub.f32 %v3336_v10, %v1075_v16 }
 0x280   : > { %v1080_v24 = vmul.f32 1.442695, %v1077_v20 }
 0x2a0   : > { %v976_v51 = vpop.xlane.xlu1 %975 }
 0x2a1   : > { %2597 = vrcp.f32 %v976_v51  ;;  %v991_v60 = vand.u32 2147483648, %v976_v51  ;;  %vm985_vm2 = vweird.f32 %v976_v51  ;;  %v989_v61 = vand.u32 2147483647, %v976_v51 }
 0x2a3   : > { %v992_v3 = vor.u32 1.1754944e-38, %v991_v60  ;;  %vm990_vm5 = vcmp.eq.f32.partialorder %v989_v61, 8.507059e+37 }
 0x2a7   : > { %v2598_v52 = vpop.eup %2597 }
 0x2a8   : > { %v981_v53 = vmul.f32 %v2598_v52, %v976_v51  ;;  %v979_v54 = vpop.xlane.xlu1 %978  ;;  %vm986_vm1 = vweird.f32 %v2598_v52 }
 0x2a9   : > { %2599 = vrcp.f32 %v979_v54  ;;  %vm987_vm3 = vmor %vm985_vm2, %vm986_vm1  ;;  %v1005_v63 = vand.u32 2147483648, %v979_v54  ;;  %v1003_v2 = vand.u32 2147483647, %v979_v54  ;;  %vm999_vm6 = vweird.f32 %v979_v54 }
 0x2aa   : > { %v982_v55 = vsub.f32 1.0, %v981_v53  ;;  %2601 = vpow2.f32 %v1080_v24 }
 0x2ab   : > { %v1006_v5 = vor.u32 1.1754944e-38, %v1005_v63  ;;  %vm1004_vm8 = vcmp.eq.f32.partialorder %v1003_v2, 8.507059e+37 }
 0x2ac   : > { %v983_v56 = vmul.f32 %v2598_v52, %v982_v55 }
 0x2ae   : > { %v984_v58 = vadd.f32 %v2598_v52, %v983_v56 }
 0x2af   : > { %v2600_v57 = vpop.eup %2599 }
 0x2b0   : > { %v995_v59 = vmul.f32 %v2600_v57, %v979_v54  ;;  %v988_v0 = vsel %vm987_vm3, %v2598_v52, %v984_v58  ;;  %vm1000_vm4 = vweird.f32 %v2600_v57 }
 0x2b1   : > { %vm1001_vm7 = vmor %vm999_vm6, %vm1000_vm4  ;;  %v993_v6 = vsel %vm990_vm5, %v992_v3, %v988_v0 }
 0x2b2   : > { %v996_v62 = vsub.f32 1.0, %v995_v59  ;;  %v1008_v11 = vmul.f32 %v3340_v17, %v993_v6 }
 0x2b4   : > { %v997_v1 = vmul.f32 %v2600_v57, %v996_v62 }
 0x2b6   : > { %v998_v4 = vadd.f32 %v2600_v57, %v997_v1 }
 0x2b8   : > { %v1002_v7 = vsel %vm1001_vm7, %v2600_v57, %v998_v4 }
 0x2b9   : > { %v1007_v8 = vsel %vm1004_vm8, %v1006_v5, %v1002_v7 }
 0x2ba   : > { %v1009_v12 = vmul.f32 %v3344_v22, %v1007_v8  ;;  %v3371_v22 = vpop.eup %2601 }
 0x2bb   : > { %v1085_v26 = vsel %vm938_vm0, %v3371_v22, 0.0 }
 0x2bc   : > { %v1010_v13 = vpack.c.bf16 %v1009_v12, %v1008_v11 }
 0x2be   : > { %2171 = vmatmul.msk.bf16.vlgmr.msrb.gmra.mxu3 %vm938_vm0, %v1010_v13 }
 0x2c0   : > { %v1339_v14 = vpop.permute.xlu1 %1338 }
 0x2c1   : > { %v1347_v15 = vsel %vm938_vm0, %v1339_v14, 0 }
 0x2c2   : > { %1355 = vmatpush.bf16.xpose.msra.mxu1 %v1347_v15 }
 0x2ca   : > { %1356 = vmatpush.bf16.xpose.msra.mxu1 %v1344_v23 }
 0x2cf   : > { %v1225_v25 = vpop.f32.mrf.mxu2 }
 0x2d0   : > { %v1230_v17 = vsel %vm938_vm0, %v1225_v25, -inf }
 0x2d1   : > { %1231 = vmax.xlane.f32.xlu0 %v1230_v17 }
 0x2d7   : > { %v1227_v43 = vpop.f32.mrf.mxu2 }
 0x2d8   : > { %v1233_v45 = vsel %vm938_vm0, %v1227_v43, -inf }
 0x2d9   : > { %1086 = vadd.xlane.f32.xlu0 %v1085_v26 }
 0x2eb   : > { %v1072_v35 = vpop.xlane.xlu1 %1071 }
 0x2ec   : > { %v1076_v36 = vsub.f32 %v3334_v9, %v1072_v35 }
 0x2ed   : > { %1121 = vrot.lane.b32.xlu0 %v3358_v47, %s2991_s29 }
 0x2ee   : > { %v1078_v40 = vmul.f32 1.442695, %v1076_v36 }
 0x2f0   : > { %2603 = vpow2.f32 %v1078_v40  ;;  %v2376_v40 = vld [vmem:[#allocation10 + $0x18] sm:$0xff] }
 0x2f1   : > { %1164 = vmatpush.bf16.msra.mxu0 %v2376_v40 }
 0x2f5   : > { %1281 = vrot.lane.b32.xlu0 %v3358_v47, %s2992_s1 }
 0x2f6   : > { %v3393_v46 = vpop.eup %2603 }
 0x2f7   : > { %v1082_v49 = vsel %vm938_vm0, %v3393_v46, 0.0 }
 0x2fd   : > { %1412 = vrot.lane.b32.xlu0 %v3360_v48, %s2993_s9 }
 0x341   : > { %v1035_v10 = vpop.f32.mrf.mxu3 }
 0x344   : > { %v1232_v29 = vpop.xlane.xlu0 %1231 }
 0x345   : > { %v1236_v37 = vsub.f32 %v1225_v25, %v1232_v29 }
 0x347   : > { %v1238_v41 = vmul.f32 1.442695, %v1236_v37 }
 0x349   : > { %v1037_v27 = vpop.f32.mrf.mxu3  ;;  %2605 = vpow2.f32 %v1238_v41 }
 0x34a   : > { %v1040_v28 = vpack.c.bf16 %v1037_v27, %v1035_v10 }
 0x34c   : > { %2191 = vmatmul.msk.bf16.vlgmr.msrb.gmra.mxu1 %vm938_vm0, %v1040_v28  ;;  %v3382_v30 = vpop.xlane.xlu0 %1086 }
 0x34d   : > { %2607 = vrcp.f32 %v3382_v30  ;;  %v1113_v12 = vand.u32 2147483648, %v3382_v30  ;;  %vm1107_vm10 = vweird.f32 %v3382_v30  ;;  %v1111_v15 = vand.u32 2147483647, %v3382_v30 }
 0x34f   : > { %v3395_v9 = vpop.eup %2605  ;;  %v1114_v25 = vor.u32 1.1754944e-38, %v1113_v12  ;;  %vm1112_vm13 = vcmp.eq.f32.partialorder %v1111_v15, 8.507059e+37 }
 0x350   : > { %v1242_v50 = vsel %vm938_vm0, %v3395_v9, 0.0 }
 0x353   : > { %v2608_v56 = vpop.eup %2607 }
 0x354   : > { %v1103_v60 = vmul.f32 %v2608_v56, %v3382_v30  ;;  %vm1108_vm9 = vweird.f32 %v2608_v56 }
 0x355   : > { %vm1109_vm11 = vmor %vm1107_vm10, %vm1108_vm9 }
 0x356   : > { %v1104_v63 = vsub.f32 1.0, %v1103_v60 }
 0x358   : > { %v1105_v4 = vmul.f32 %v2608_v56, %v1104_v63 }
 0x35a   : > { %v1106_v7 = vadd.f32 %v2608_v56, %v1105_v4 }
 0x35c   : > { %2203 = vmatmul.msk.bf16.vlgmr.msra.gmra.mxu1 %vm938_vm0, %v1335_v31  ;;  %v1110_v20 = vsel %vm1109_vm11, %v2608_v56, %v1106_v7 }
 0x35d   : > { %v1115_v10 = vsel %vm1112_vm13, %v1114_v25, %v1110_v20 }
 0x35e   : > { %v1117_v30 = vmul.f32 %v3371_v22, %v1115_v10 }
 0x35f   : > { %v1122_v32 = vpop.permute.xlu0 %1121 }
 0x360   : > { %1134 = vmatpush.bf16.msra.mxu3 %v1122_v32 }
 0x367   : > { %v1282_v13 = vpop.permute.xlu0 %1281 }
 0x3c9   : > { %v3385_v33 = vpop.f32.mrf.mxu1 }
 0x3d1   : > { %v3387_v34 = vpop.f32.mrf.mxu1 }
 0x3d9   : > { %v1358_v38 = vpop.f32.mrf.mxu1 }
 0x3da   : > { %v1363_v39 = vsel %vm938_vm0, %v1358_v38, -inf }
 0x3db   : > { %1364 = vmax.xlane.f32.xlu2 %v1363_v39 }
 0x3e1   : > { %v1360_v42 = vpop.f32.mrf.mxu1 }
 0x3e2   : > { %v1366_v44 = vsel %vm938_vm0, %v1360_v42, -inf }
 0x3e3   : > { %1367 = vmax.xlane.f32.xlu1 %v1366_v44  ;;  %1234 = vmax.xlane.f32.xlu2 %v1233_v45  ;;  %v2375_v44 = vld [vmem:[#allocation10 + $0x10] sm:$0xff] }
 0x3e4   : > { %1165 = vmatpush.bf16.msra.mxu0 %v2375_v44  ;;  %v2589_v44 = vld [vmem:[%s3630_s3] ss:$0 sm:$0xff]  ;;  %s1899_s3 = sadd.s32 %s2344_s12, %s2343_s13  ;;  %s2865_s13 = scalar_lea.hbm %s3636_s11, 64 }
 0x3e5   : > { %s2345_s5 = sshll.u32 %s1899_s3, 3 }
 0x3e6   : > { %s1901_s25 = scalar_lea.hbm %s3636_s11, %s2345_s5 }
 0x3e7   : > { %s1904_s8 = sshll.u32 %s1901_s25, 4  ;;  %s1905_s8 = int_to_ptr.hbm [resolvable:$true] %s1904_s8 }
 0x3eb   : > { %1083 = vadd.xlane.f32.xlu1 %v1082_v49  ;;  %1243 = vadd.xlane.f32.xlu2 %v1242_v50 }
 0x403   : > { %1119 = vrot.lane.b32.xlu2 %v3360_v48, %s2991_s29  ;;  %s3633_s29 = sld [smem:[#allocation32_spill]] }
 0x44e   : > { %v1365_v51 = vpop.xlane.xlu2 %1364 }
 0x44f   : > { %v1369_v52 = vsub.f32 %v1358_v38, %v1365_v51 }
 0x451   : > { %v1371_v53 = vmul.f32 1.442695, %v1369_v52 }
 0x453   : > { %2609 = vpow2.f32 %v1371_v53 }
 0x456   : > { %v1368_v54 = vpop.xlane.xlu1 %1367  ;;  %v1235_v55 = vpop.xlane.xlu2 %1234 }
 0x457   : > { %v1237_v57 = vsub.f32 %v1227_v43, %v1235_v55  ;;  %v1370_v61 = vsub.f32 %v1360_v42, %v1368_v54 }
 0x459   : > { %v3404_v58 = vpop.eup %2609  ;;  %v1240_v59 = vmul.f32 1.442695, %v1237_v57  ;;  %v1373_v0 = vmul.f32 1.442695, %v1370_v61 }
 0x45a   : > { %v1375_v62 = vsel %vm938_vm0, %v3404_v58, 0.0 }
 0x45b   : > { %1376 = vadd.xlane.f32.xlu2 %v1375_v62  ;;  %2611 = vpow2.f32 %v1240_v59 }
 0x45e   : > { %v1084_v1 = vpop.xlane.xlu1 %1083  ;;  %v3409_v2 = vpop.xlane.xlu2 %1243 }
 0x45f   : > { %2613 = vrcp.f32 %v1084_v1  ;;  %v1099_v21 = vand.u32 2147483648, %v1084_v1  ;;  %v1097_v24 = vand.u32 2147483647, %v1084_v1  ;;  %vm1093_vm14 = vweird.f32 %v1084_v1 }
 0x460   : > { %2615 = vpow2.f32 %v1373_v0  ;;  %v1259_v45 = vand.u32 2147483648, %v3409_v2  ;;  %vm1253_vm3 = vweird.f32 %v3409_v2 }
 0x461   : > { %v3411_v3 = vpop.eup %2611  ;;  %v1100_v27 = vor.u32 1.1754944e-38, %v1099_v21  ;;  %vm1098_vm1 = vcmp.eq.f32.partialorder %v1097_v24, 8.507059e+37  ;;  %2617 = vrcp.f32 %v3409_v2 }
 0x462   : > { %v1245_v5 = vsel %vm938_vm0, %v3411_v3, 0.0  ;;  %v1260_v55 = vor.u32 1.1754944e-38, %v1259_v45 }
 0x463   : > { %1246 = vadd.xlane.f32.xlu1 %v1245_v5 }
 0x465   : > { %v2614_v6 = vpop.eup %2613 }
 0x466   : > { %v1089_v8 = vmul.f32 %v2614_v6, %v1084_v1  ;;  %v1120_v11 = vpop.permute.xlu2 %1119  ;;  %v3416_v14 = vpop.eup %2615  ;;  %vm1094_vm12 = vweird.f32 %v2614_v6 }
 0x467   : > { %1135 = vmatpush.bf16.msra.mxu3 %v1120_v11  ;;  %v1378_v17 = vsel %vm938_vm0, %v3416_v14, 0.0  ;;  %vm1095_vm15 = vmor %vm1093_vm14, %vm1094_vm12  ;;  %v2618_v36 = vpop.eup %2617 }
 0x468   : > { %v1090_v16 = vsub.f32 1.0, %v1089_v8  ;;  %v1249_v37 = vmul.f32 %v2618_v36, %v3409_v2  ;;  %vm1254_vm2 = vweird.f32 %v2618_v36 }
 0x469   : > { %vm1255_vm4 = vmor %vm1253_vm3, %vm1254_vm2 }
 0x46a   : > { %v1091_v23 = vmul.f32 %v2614_v6, %v1090_v16  ;;  %v1250_v22 = vsub.f32 1.0, %v1249_v37  ;;  %v2379_v37 = vld [vmem:[#allocation10 + $0x30] sm:$0xff] }
 0x46b   : > { %1294 = vmatpush.bf16.msrb.mxu3 %v1282_v13  ;;  %1379 = vadd.xlane.f32.xlu1 %v1378_v17 }
 0x46c   : > { %v1092_v26 = vadd.f32 %v2614_v6, %v1091_v23 }
 0x46e   : > { %v1096_v28 = vsel %vm1095_vm15, %v2614_v6, %v1092_v26 }
 0x46f   : > { %v1101_v29 = vsel %vm1098_vm1, %v1100_v27, %v1096_v28  ;;  %v1413_v27 = vpop.permute.xlu0 %1412 }
 0x470   : > { %v1116_v31 = vmul.f32 %v3393_v46, %v1101_v29  ;;  %v1257_v46 = vand.u32 2147483647, %v3409_v2 }
 0x472   : > { %v1118_v32 = vpack.c.bf16 %v1117_v30, %v1116_v31  ;;  %vm1258_vm6 = vcmp.eq.f32.partialorder %v1257_v46, 8.507059e+37 }
 0x473   : > { %1279 = vrot.lane.b32.xlu2 %v3360_v48, %s2992_s1  ;;  %v1251_v48 = vmul.f32 %v2618_v36, %v1250_v22  ;;  %s2859_s1 = sshra.s32 %s1905_s8, 4  ;;  %s2860_s1 = int_to_ptr.hbm [resolvable:$true] %s2859_s1 }
 0x474   : > { %2173 = vmatmul.msk.bf16.vlgmr.msra.gmra.mxu3 %vm938_vm0, %v1118_v32  ;;  %v2378_v32 = vld [vmem:[#allocation10 + $0x28] sm:$0xff]  ;;  %p2866_p12 = scmp.lt.s32.totalorder %s2860_s1, %s3636_s11 }
 0x475   : > { %v1252_v43 = vadd.f32 %v2618_v36, %v1251_v48  ;;  %1324 = vmatpush.bf16.msrb.mxu0 %v2378_v32 }
 0x477   : > { %v1256_v52 = vsel %vm1255_vm4, %v2618_v36, %v1252_v43  ;;  %v2380_v36 = vld [vmem:[#allocation10 + $0x38] sm:$0xff] }
 0x478   : > { %v1261_v60 = vsel %vm1258_vm6, %v1260_v55, %v1256_v52 }
 0x479   : > { %v1276_v1 = vmul.f32 %v3395_v9, %v1261_v60  ;;  %v2272_v60 = vld [vmem:[#allocation11 + $0x70] sm:$0xf] }
 0x484   : > { %1414 = vrot.lane.b32.xlu1 %v3358_v47, %s2993_s9  ;;  %s2861_s9 = scalar_lea.hbm %s2860_s1, 16 }
 0x485   : > { %p2862_p3 = scmp.ne.s32.totalorder %s2860_s1, %s2861_s9  ;;  %p2867_p13 = scmp.lt.s32.totalorder %s2865_s13, %s2861_s9 }
 0x487   : > { %p2863_p8 = pnand %p2862_p3, %p3238_p7  ;;  %p2868_p0 = por %p2867_p13, %p2866_p12 }
 0x489   : > { %p2864_p9 = pneg %p2863_p8 }
 0x48b   : > { %p2869_p2 = pnand %p2868_p0, %p2864_p9 }
 0x4ce   : > { %v3430_v35 = vpop.xlane.xlu2 %1376 }
 0x4cf   : > { %v1392_v16 = vand.u32 2147483648, %v3430_v35  ;;  %vm1386_vm14 = vweird.f32 %v3430_v35  ;;  %v1390_v9 = vand.u32 2147483647, %v3430_v35 }
 0x4d1   : > { %v1393_v23 = vor.u32 1.1754944e-38, %v1392_v16  ;;  %vm1391_vm2 = vcmp.eq.f32.partialorder %v1390_v9, 8.507059e+37  ;;  %v2258_v9 = vld [vmem:[#allocation11 + $0x58] sm:$0xf0] }
 0x4d6   : > { %v1280_v38 = vpop.permute.xlu2 %1279  ;;  %v1247_v39 = vpop.xlane.xlu1 %1246 }
 0x4d7   : > { %1295 = vmatpush.bf16.msrb.mxu3 %v1280_v38  ;;  %2619 = vrcp.f32 %v1247_v39  ;;  %v1273_v51 = vand.u32 2147483648, %v1247_v39  ;;  %v1271_v54 = vand.u32 2147483647, %v1247_v39  ;;  %vm1267_vm7 = vweird.f32 %v1247_v39 }
 0x4d8   : > { %2621 = vrcp.f32 %v3430_v35 }
 0x4d9   : > { %v1274_v61 = vor.u32 1.1754944e-38, %v1273_v51  ;;  %vm1272_vm9 = vcmp.eq.f32.partialorder %v1271_v54, 8.507059e+37 }
 0x4db   : > { %1457 = vmatpush.bf16.msra.mxu3 %v2380_v36  ;;  %v2232_v36 = vld [vmem:[#allocation11 + $0x20] sm:$0xf] }
 0x4dd   : > { %v2620_v41 = vpop.eup %2619 }
 0x4de   : > { %v1263_v47 = vmul.f32 %v2620_v41, %v1247_v39  ;;  %v1380_v42 = vpop.xlane.xlu1 %1379  ;;  %v2622_v50 = vpop.eup %2621  ;;  %vm1268_vm5 = vweird.f32 %v2620_v41 }
 0x4df   : > { %2623 = vrcp.f32 %v1380_v42  ;;  %v1382_v56 = vmul.f32 %v2622_v50, %v3430_v35  ;;  %vm1269_vm8 = vmor %vm1267_vm7, %vm1268_vm5  ;;  %v1406_v12 = vand.u32 2147483648, %v1380_v42  ;;  %vm1387_vm11 = vweird.f32 %v2622_v50  ;;  %v2377_v35 = vld [vmem:[#allocation10 + $0x20] sm:$0xff]  ;;  %1458 = vmatpush.bf16.msra.mxu3 %v2379_v37  ;;  %v2386_v37 = vld [vmem:[#allocation11 + $0x24] sm:$0xf0] }
 0x4e0   : > { %v1264_v49 = vsub.f32 1.0, %v1263_v47  ;;  %vm1400_vm12 = vweird.f32 %v1380_v42  ;;  %v1404_v15 = vand.u32 2147483647, %v1380_v42  ;;  %vm1388_vm15 = vmor %vm1386_vm14, %vm1387_vm11  ;;  %1325 = vmatpush.bf16.msrb.mxu0 %v2377_v35 }
 0x4e1   : > { %v1383_v2 = vsub.f32 1.0, %v1382_v56  ;;  %v1407_v21 = vor.u32 1.1754944e-38, %v1406_v12  ;;  %v2256_v12 = vld [vmem:[#allocation11 + $0x50] sm:$0xf] }
 0x4e2   : > { %v1265_v53 = vmul.f32 %v2620_v41, %v1264_v49  ;;  %vm1405_vm1 = vcmp.eq.f32.partialorder %v1404_v15, 8.507059e+37  ;;  %v2391_v15 = vld [vmem:[#allocation11 + $0x54] sm:$0xf] }
 0x4e3   : > { %v1384_v8 = vmul.f32 %v2622_v50, %v1383_v2 }
 0x4e4   : > { %v1266_v57 = vadd.f32 %v2620_v41, %v1265_v53 }
 0x4e5   : > { %v2624_v59 = vpop.eup %2623  ;;  %v1385_v13 = vadd.f32 %v2622_v50, %v1384_v8 }
 0x4e6   : > { %v1270_v62 = vsel %vm1269_vm8, %v2620_v41, %v1266_v57  ;;  %v1396_v63 = vmul.f32 %v2624_v59, %v1380_v42  ;;  %vm1401_vm10 = vweird.f32 %v2624_v59 }
 0x4e7   : > { %v1275_v0 = vsel %vm1272_vm9, %v1274_v61, %v1270_v62  ;;  %vm1402_vm13 = vmor %vm1400_vm12, %vm1401_vm10  ;;  %v1389_v20 = vsel %vm1388_vm15, %v2622_v50, %v1385_v13  ;;  %v2396_v61 = vld [vmem:[#allocation11 + $0x74] sm:$0xf0]  ;;  %v2395_v62 = vld [vmem:[#allocation11 + $0x74] sm:$0xf] }
 0x4e8   : > { %v1277_v4 = vmul.f32 %v3411_v3, %v1275_v0  ;;  %v1397_v5 = vsub.f32 1.0, %v1396_v63  ;;  %v1394_v26 = vsel %vm1391_vm2, %v1393_v23, %v1389_v20  ;;  %v2273_v63 = vor.u32 %v2396_v61, %v2272_v60  ;;  %v2274_v0 = vld [vmem:[#allocation11 + $0x78] sm:$0xf0]  ;;  %v2392_v13 = vld [vmem:[#allocation11 + $0x54] sm:$0xf0] }
 0x4e9   : > { %v1409_v28 = vmul.f32 %v3404_v58, %v1394_v26  ;;  %v2257_v16 = vor.u32 %v2392_v13, %v2256_v12  ;;  %v2248_v20 = vld [vmem:[#allocation11 + $0x40] sm:$0xf]  ;;  %v2390_v23 = vld [vmem:[#allocation11 + $0x44] sm:$0xf0] }
 0x4ea   : > { %v1398_v6 = vmul.f32 %v2624_v59, %v1397_v5  ;;  %v1278_v7 = vpack.c.bf16 %v1277_v4, %v1276_v1  ;;  %v2277_v1 = vor.u32 %v2395_v62, %v2274_v0  ;;  %v2394_v4 = vld [vmem:[#allocation11 + $0x64] sm:$0xf0]  ;;  %v2393_v5 = vld [vmem:[#allocation11 + $0x64] sm:$0xf]  ;;  %v2412_v0 = vld [vmem:[#allocation13 + $0x78] sm:$0xff] }
 0x4eb   : > { %v2401_v13 = vld [vmem:[#allocation13 + $0x20] sm:$0xff] }
 0x4ec   : > { %2193 = vmatmul.msk.bf16.vlgmr.msrb.gmra.mxu3 %vm938_vm0, %v1278_v7  ;;  %v1399_v11 = vadd.f32 %v2624_v59, %v1398_v6  ;;  %1655 = vmatpush.bf16.msrb.mxu1 %v2277_v1  ;;  %v2266_v7 = vld [vmem:[#allocation11 + $0x68] sm:$0xf0] }
 0x4ed   : > { %v2269_v8 = vor.u32 %v2393_v5, %v2266_v7  ;;  %1821 = vmatpush.bf16.msrb.mxu3 %v2412_v0  ;;  %v2402_v7 = vld [vmem:[#allocation13 + $0x28] sm:$0xff] }
 0x4ee   : > { %v1403_v3 = vsel %vm1402_vm13, %v2624_v59, %v1399_v11 }
 0x4ef   : > { %v1408_v24 = vsel %vm1405_vm1, %v1407_v21, %v1403_v3  ;;  %v2261_v3 = vor.u32 %v2391_v15, %v2258_v9  ;;  %v2409_v15 = vld [vmem:[#allocation13 + $0x60] sm:$0xff] }
 0x4f0   : > { %v1410_v10 = vmul.f32 %v3416_v14, %v1408_v24  ;;  %1656 = vmatpush.bf16.msrb.mxu1 %v2269_v8  ;;  %v2389_v24 = vld [vmem:[#allocation11 + $0x44] sm:$0xf]  ;;  %v2410_v8 = vld [vmem:[#allocation13 + $0x68] sm:$0xff] }
 0x4f2   : > { %v1411_v29 = vpack.c.bf16 %v1410_v10, %v1409_v28  ;;  %v2388_v28 = vld [vmem:[#allocation11 + $0x34] sm:$0xf0] }
 0x4f4   : > { %1657 = vmatpush.bf16.msrb.mxu1 %v2261_v3 }
 0x4f6   : > { %v1415_v25 = vpop.permute.xlu1 %1414 }
 0x4f7   : > { %v1137_v17 = vpop.f32.mrf.mxu3  ;;  %1427 = vmatpush.bf16.msra.mxu2 %v1415_v25  ;;  %v2249_v25 = vor.u32 %v2390_v23, %v2248_v20 }
 0x4fb   : > { %1428 = vmatpush.bf16.msra.mxu2 %v1413_v27  ;;  %v2240_v27 = vld [vmem:[#allocation11 + $0x30] sm:$0xf] }
 0x4fe   : > { %2204 = vmatmul.msk.bf16.vlgmr.msra.gmra.mxu2 %vm938_vm0, %v1411_v29  ;;  %v2387_v29 = vld [vmem:[#allocation11 + $0x34] sm:$0xf] }
 0x4ff   : > { %v1139_v30 = vpop.f32.mrf.mxu3 }
 0x500   : > { %v1142_v31 = vpack.c.bf16 %v1139_v30, %v1137_v17  ;;  %v2250_v17 = vld [vmem:[#allocation11 + $0x48] sm:$0xf0]  ;;  %v2241_v30 = vor.u32 %v2388_v28, %v2240_v27 }
 0x501   : > { %v2253_v26 = vor.u32 %v2389_v24, %v2250_v17 }
 0x502   : > { %2182 = vmatmul.msk.bf16.vlgmr.msra.gmra.mxu0 %vm938_vm0, %v1142_v31  ;;  %v2242_v31 = vld [vmem:[#allocation11 + $0x38] sm:$0xf0] }
 0x503   : > { %1641 = vmatpush.bf16.msra.mxu0 %v2273_v63  ;;  %1658 = vmatpush.bf16.msrb.mxu1 %v2253_v26  ;;  %v2245_v32 = vor.u32 %v2387_v29, %v2242_v31  ;;  %v2404_v63 = vld [vmem:[#allocation13 + $0x38] sm:$0xff] }
 0x504   : > { %1807 = vmatpush.bf16.msrb.mxu2 %v2404_v63 }
 0x507   : > { %1659 = vmatpush.bf16.msrb.mxu1 %v2245_v32 }
 0x56f   : > { %v1297_v14 = vpop.f32.mrf.mxu3 }
 0x577   : > { %v1299_v38 = vpop.f32.mrf.mxu3 }
 0x578   : > { %v1302_v22 = vpack.c.bf16 %v1299_v38, %v1297_v14  ;;  %v2385_v14 = vld [vmem:[#allocation11 + $0x24] sm:$0xf]  ;;  %v2233_v38 = vor.u32 %v2386_v37, %v2232_v36 }
 0x57a   : > { %2202 = vmatmul.msk.bf16.vlgmr.msrb.gmra.mxu0 %vm938_vm0, %v1302_v22  ;;  %v2234_v22 = vld [vmem:[#allocation11 + $0x28] sm:$0xf0] }
 0x57f   : > { %v1167_v48 = vpop.f32.mrf.mxu0 }
 0x580   : > { %v1197_v47 = vadd.f32 %v3385_v33, %v1167_v48 }
 0x581   : > { %v1430_v58 = vpop.f32.mrf.mxu2 }
 0x587   : > { %v1169_v41 = vpop.f32.mrf.mxu0 }
 0x588   : > { %v1199_v51 = vadd.f32 %v3387_v34, %v1169_v41  ;;  %v2224_v41 = vld [vmem:[#allocation11 + $0x10] sm:$0xf] }
 0x589   : > { %v1432_v39 = vpop.f32.mrf.mxu2 }
 0x58a   : > { %v1435_v40 = vpack.c.bf16 %v1432_v39, %v1430_v58  ;;  %v2237_v39 = vor.u32 %v2385_v14, %v2234_v22  ;;  %v2399_v22 = vld [vmem:[#allocation13 + $0x10] sm:$0xff] }
 0x58c   : > { %2213 = vmatmul.msk.bf16.vlgmr.msra.gmra.mxu3 %vm938_vm0, %v1435_v40  ;;  %1660 = vmatpush.bf16.msrb.mxu1 %v2237_v39  ;;  %v2398_v39 = vld [vmem:[#allocation13 + $0x8] sm:$0xff] }
 0x5f7   : > { %v1327_v43 = vpop.f32.mrf.mxu0 }
 0x5f8   : > { %v1332_v42 = vadd.f32 %v1327_v43, %v1197_v47  ;;  %v2384_v43 = vld [vmem:[#allocation11 + $0x14] sm:$0xf0]  ;;  %v2383_v47 = vld [vmem:[#allocation11 + $0x14] sm:$0xf] }
 0x5ff   : > { %v1329_v50 = vpop.f32.mrf.mxu0 }
 0x600   : > { %v1333_v53 = vadd.f32 %v1329_v50, %v1199_v51  ;;  %v2382_v50 = vld [vmem:[#allocation11 + $0x4] sm:$0xf0] }
 0x60f   : > { %v1460_v45 = vpop.f32.mrf.mxu3 }
 0x610   : > { %v1465_v46 = vadd.f32 %v1460_v45, %v1332_v42  ;;  %v2225_v45 = vor.u32 %v2384_v43, %v2224_v41  ;;  %v2405_v41 = vld [vmem:[#allocation13 + $0x40] sm:$0xff] }
 0x611   : > { %v1555_v43 = vld [vmem:[%s3633_s29] sm:$0x3]  ;;  %s1888_s29 = scalar_lea.sflag [#allocation4], %s625_s16 }
 0x612   : > { %v1471_v49 = vadd.f32 %v2589_v44, %v1465_v46  ;;  %v2226_v46 = vld [vmem:[#allocation11 + $0x18] sm:$0xf0] }
 0x613   : > { %v2229_v51 = vor.u32 %v2383_v47, %v2226_v46 }
 0x614   : > { %v3456_v52 = vadd.f32 %v1471_v49, %v3291_v18  ;;  %v2994_v18 = vmov 128.0   ;;  %v2216_v49 = vld [vmem:[#allocation11] sm:$0xf] }
 0x615   : > { %2625 = vrcp.f32 %v2994_v18  ;;  %1661 = vmatpush.bf16.msrb.mxu1 %v2229_v51 }
 0x616   : > { %1477 = vadd.xlane.f32.xlu0 %v3456_v52  ;;  %v1490_v33 = vmul.f32 %v3456_v52, %v3456_v52 }
 0x617   : > { %v1462_v54 = vpop.f32.mrf.mxu3 }
 0x618   : > { %v1466_v55 = vadd.f32 %v1462_v54, %v1333_v53  ;;  %1492 = vadd.xlane.f32.xlu2 %v1490_v33  ;;  %v2381_v53 = vld [vmem:[#allocation11 + $0x4] sm:$0xf]  ;;  %v2218_v33 = vld [vmem:[#allocation11 + $0x8] sm:$0xf0] }
 0x61a   : > { %v1472_v56 = vadd.f32 %v2589_v44, %v1466_v55  ;;  %v2217_v55 = vor.u32 %v2382_v50, %v2216_v49 }
 0x61b   : > { %v2626_v59 = vpop.eup %2625 }
 0x61c   : > { %v3462_v57 = vadd.f32 %v1472_v56, %v3293_v19  ;;  %v1482_v2 = vmul.f32 128.0, %v2626_v59  ;;  %v2264_v19 = vld [vmem:[#allocation11 + $0x60] sm:$0xf]  ;;  %vm1486_vm0 = vweird.f32 %v2626_v59  ;;  %v2221_v56 = vor.u32 %v2381_v53, %v2218_v33 }
 0x61d   : > { %v2265_v6 = vor.u32 %v2394_v4, %v2264_v19  ;;  %v2411_v19 = vld [vmem:[#allocation13 + $0x70] sm:$0xff] }
 0x61e   : > { %1479 = vadd.xlane.f32.xlu1 %v3462_v57  ;;  %v1491_v34 = vmul.f32 %v3462_v57, %v3462_v57  ;;  %v1483_v11 = vsub.f32 1.0, %v1482_v2  ;;  %1662 = vmatpush.bf16.msrb.mxu1 %v2221_v56  ;;  %v2403_v2 = vld [vmem:[#allocation13 + $0x30] sm:$0xff] }
 0x61f   : > { %1642 = vmatpush.bf16.msra.mxu0 %v2265_v6  ;;  %1808 = vmatpush.bf16.msrb.mxu2 %v2403_v2 }
 0x620   : > { %1494 = vadd.xlane.f32.xlu0 %v1491_v34  ;;  %v1484_v21 = vmul.f32 %v2626_v59, %v1483_v11  ;;  %1822 = vmatpush.bf16.msrb.mxu3 %v2411_v19 }
 0x622   : > { %v1485_v10 = vadd.f32 %v2626_v59, %v1484_v21 }
 0x623   : > { %1643 = vmatpush.bf16.msra.mxu0 %v2257_v16  ;;  %1809 = vmatpush.bf16.msrb.mxu2 %v2402_v7 }
 0x624   : > { %v3467_v35 = vsel %vm1486_vm0, %v2626_v59, %v1485_v10  ;;  %1823 = vmatpush.bf16.msrb.mxu3 %v2410_v8  ;;  %v3482_v10 = vld [vmem:[%s3631_s7] ss:$0 sm:$0xff] }
 0x627   : > { %1644 = vmatpush.bf16.msra.mxu0 %v2249_v25  ;;  %1810 = vmatpush.bf16.msrb.mxu2 %v2401_v13 }
 0x628   : > { %1824 = vmatpush.bf16.msrb.mxu3 %v2409_v15 }
 0x62b   : > { %1645 = vmatpush.bf16.msra.mxu0 %v2241_v30 }
 0x62f   : > { %1646 = vmatpush.bf16.msra.mxu0 %v2233_v38  ;;  %v2408_v38 = vld [vmem:[#allocation13 + $0x58] sm:$0xff] }
 0x630   : > { %1825 = vmatpush.bf16.msrb.mxu3 %v2408_v38 }
 0x633   : > { %1647 = vmatpush.bf16.msra.mxu0 %v2225_v45  ;;  %v1558_v45 = vperm.slane %v1555_v43, 1 }
 0x637   : > { %1648 = vmatpush.bf16.msra.mxu0 %v2217_v55 }
 0x689   : > { %v1478_v58 = vpop.xlane.xlu0 %1477 }
 0x68a   : > { %v3470_v40 = vmul.f32 %v3467_v35, %v1478_v58  ;;  %v2407_v58 = vld [vmem:[#allocation13 + $0x50] sm:$0xff] }
 0x68b   : > { %v1493_v48 = vpop.xlane.xlu2 %1492  ;;  %1826 = vmatpush.bf16.msrb.mxu3 %v2407_v58 }
 0x68c   : > { %v1498_v42 = vmul.f32 %v3470_v40, %v3470_v40  ;;  %v1496_v44 = vmul.f32 %v1493_v48, %v3467_v35  ;;  %v1502_v25 = vsub.f32 %v3456_v52, %v3470_v40  ;;  %v3489_v52 = vld [vmem:[%s3632_s30] ss:$0 sm:$0xff]  ;;  %v2406_v40 = vld [vmem:[#allocation13 + $0x48] sm:$0xff]  ;;  %s627_s30 = scalar_lea.vmem [#allocation14], %s2072_s2 }
 0x68d   : > { %v2397_v48 = vld [vmem:[#allocation13] sm:$0xff]  ;;  %s1902_s14 = sshll.u32 %s627_s30, 4  ;;  %s1903_s14 = int_to_ptr.vmem [resolvable:$true] %s1902_s14 }
 0x68e   : > { %v1500_v54 = vsub.f32 %v1496_v44, %v1498_v42  ;;  %v1557_v44 = vperm.slane %v1555_v43, 0 }
 0x68f   : > { %1827 = vmatpush.bf16.msrb.mxu3 %v2406_v40 }
 0x690   : > { %v1504_v34 = vadd.f32 1e-05, %v1500_v54 }
 0x691   : > { %v1480_v18 = vpop.xlane.xlu1 %1479 }
 0x692   : > { %2627 = vrsqrt.f32 %v1504_v34  ;;  %v1489_v59 = vmul.f32 %v3467_v35, %v1480_v18  ;;  %vm1512_vm4 = vweird.f32 %v1504_v34 }
 0x693   : > { %v1495_v60 = vpop.xlane.xlu0 %1494  ;;  %1828 = vmatpush.bf16.msrb.mxu3 %v2405_v41 }
 0x694   : > { %v1499_v61 = vmul.f32 %v1489_v59, %v1489_v59  ;;  %v1497_v62 = vmul.f32 %v1495_v60, %v3467_v35  ;;  %v1503_v28 = vsub.f32 %v3462_v57, %v1489_v59  ;;  %v2400_v57 = vld [vmem:[#allocation13 + $0x18] sm:$0xff]  ;;  %v2592_v60 = vld [vmem:[%s3634_s21] ss:$0 sm:$0xff] }
 0x695   : > { %1811 = vmatpush.bf16.msrb.mxu2 %v2400_v57 }
 0x696   : > { %v1501_v1 = vsub.f32 %v1497_v62, %v1499_v61 }
 0x698   : > { %v2628_v4 = vpop.eup %2627  ;;  %v1505_v5 = vadd.f32 1e-05, %v1501_v1 }
 0x699   : > { %v1507_v6 = vmul.f32 %v2628_v4, %v1504_v34  ;;  %vm1513_vm3 = vweird.f32 %v2628_v4  ;;  %1812 = vmatpush.bf16.msrb.mxu2 %v2399_v22 }
 0x69a   : > { %2629 = vrsqrt.f32 %v1505_v5  ;;  %vm1514_vm5 = vmor %vm1512_vm4, %vm1513_vm3  ;;  %vm1522_vm7 = vweird.f32 %v1505_v5 }
 0x69b   : > { %v1508_v11 = vmul.f32 %v2628_v4, %v1507_v6 }
 0x69d   : > { %v1509_v12 = vmul.f32 0.5, %v1508_v11  ;;  %1813 = vmatpush.bf16.msrb.mxu2 %v2398_v39 }
 0x69f   : > { %v1510_v16 = vsub.f32 1.5, %v1509_v12 }
 0x6a0   : > { %v2630_v9 = vpop.eup %2629 }
 0x6a1   : > { %v1511_v3 = vmul.f32 %v2628_v4, %v1510_v16  ;;  %v1517_v21 = vmul.f32 %v2630_v9, %v1505_v5  ;;  %vm1523_vm6 = vweird.f32 %v2630_v9  ;;  %1814 = vmatpush.bf16.msrb.mxu2 %v2397_v48 }
 0x6a2   : > { %vm1524_vm8 = vmor %vm1522_vm7, %vm1523_vm6 }
 0x6a3   : > { %v1518_v20 = vmul.f32 %v2630_v9, %v1517_v21  ;;  %v1515_v23 = vsel %vm1514_vm5, %v2628_v4, %v1511_v3 }
 0x6a4   : > { %v1526_v26 = vmul.f32 %v1515_v23, %v1502_v25 }
 0x6a5   : > { %v1519_v24 = vmul.f32 0.5, %v1518_v20 }
 0x6a6   : > { %v1531_v31 = vmul.f32 %v3482_v10, %v1526_v26 }
 0x6a7   : > { %v1520_v17 = vsub.f32 1.5, %v1519_v24 }
 0x6a8   : > { %v1536_v36 = vadd.f32 %v3489_v52, %v1531_v31 }
 0x6a9   : > { %v1521_v27 = vmul.f32 %v2630_v9, %v1520_v17 }
 0x6ab   : > { %v1525_v29 = vsel %vm1524_vm8, %v2630_v9, %v1521_v27 }
 0x6ac   : > { %v1527_v30 = vmul.f32 %v1525_v29, %v1503_v28 }
 0x6ae   : > { %v1532_v32 = vmul.f32 %v3482_v10, %v1527_v30 }
 0x6b0   : > { %v1537_v37 = vadd.f32 %v3489_v52, %v1532_v32 }
 0x6b2   : > { %v1538_v14 = vpack.c.bf16 %v1537_v37, %v1536_v36 }
 0x6b4   : > { %1649 = vmatmul.bf16.vlgmr.msra.gmra.mxu0 %v1538_v14  ;;  %1663 = vmatmul.bf16.vlgmr.msrb.gmra.mxu1 %v1538_v14 }
 0x731   : > { %v1650_v47 = vpop.f32.mrf.mxu0  ;;  %v1664_v42 = vpop.f32.mrf.mxu1 }
 0x732   : > { %v1651_v46 = vadd.f32 %v1650_v47, %v1557_v44  ;;  %v1665_v49 = vadd.f32 %v1664_v42, %v1558_v45 }
 0x734   : > { %v1669_v54 = vmax.f32 %v1651_v46, 0.0  ;;  %v1670_v55 = vmax.f32 %v1665_v49, 0.0 }
 0x739   : > { %v1652_v50 = vpop.f32.mrf.mxu0  ;;  %v1666_v51 = vpop.f32.mrf.mxu1 }
 0x73a   : > { %v1653_v53 = vadd.f32 %v1652_v50, %v1557_v44  ;;  %v1667_v33 = vadd.f32 %v1666_v51, %v1558_v45 }
 0x73c   : > { %v1671_v56 = vmax.f32 %v1653_v53, 0.0  ;;  %v1672_v34 = vmax.f32 %v1667_v33, 0.0 }
 0x73e   : > { %v1673_v18 = vpack.c.bf16 %v1671_v56, %v1669_v54  ;;  %v1674_v59 = vpack.c.bf16 %v1672_v34, %v1670_v55 }
 0x740   : > { %1815 = vmatmul.bf16.vlgmr.msrb.gmra.mxu2 %v1673_v18  ;;  %1829 = vmatmul.bf16.vlgmr.msrb.gmra.mxu3 %v1674_v59 }
 0x7c3   : > { %v1816_v61 = vpop.f32.mrf.mxu2  ;;  %v1830_v62 = vpop.f32.mrf.mxu3 }
 0x7c4   : > { %v1817_v63 = vadd.f32 %v2592_v60, %v1816_v61 }
 0x7c6   : > { %v1831_v0 = vadd.f32 %v1830_v62, %v1817_v63 }
 0x7c8   : > { %v1835_v1 = vadd.f32 %v1831_v0, %v1536_v36 }
 0x7ca   : > { %1837 = vadd.xlane.f32.xlu1 %v1835_v1  ;;  %v1843_v2 = vmul.f32 %v1835_v1, %v1835_v1 }
 0x7cb   : > { %v1818_v19 = vpop.f32.mrf.mxu2  ;;  %v1832_v5 = vpop.f32.mrf.mxu3 }
 0x7cc   : > { %v1819_v4 = vadd.f32 %v2592_v60, %v1818_v19  ;;  %1845 = vadd.xlane.f32.xlu0 %v1843_v2 }
 0x7ce   : > { %v1833_v6 = vadd.f32 %v1832_v5, %v1819_v4 }
 0x7d0   : > { %v1836_v7 = vadd.f32 %v1833_v6, %v1537_v37 }
 0x7d2   : > { %1839 = vadd.xlane.f32.xlu2 %v1836_v7  ;;  %v1844_v8 = vmul.f32 %v1836_v7, %v1836_v7 }
 0x7d4   : > { %1847 = vadd.xlane.f32.xlu1 %v1844_v8 }
 0x83d   : > { %v1838_v11 = vpop.xlane.xlu1 %1837 }
 0x83e   : > { %v1841_v12 = vmul.f32 %v1838_v11, %v3467_v35 }
 0x83f   : > { %v1846_v13 = vpop.xlane.xlu0 %1845 }
 0x840   : > { %v1851_v15 = vmul.f32 %v1841_v12, %v1841_v12  ;;  %v1849_v16 = vmul.f32 %v1846_v13, %v3467_v35  ;;  %v1855_v14 = vsub.f32 %v1835_v1, %v1841_v12 }
 0x842   : > { %v1853_v9 = vsub.f32 %v1849_v16, %v1851_v15 }
 0x844   : > { %v1857_v3 = vadd.f32 1e-05, %v1853_v9 }
 0x845   : > { %v1840_v21 = vpop.xlane.xlu2 %1839 }
 0x846   : > { %2631 = vrsqrt.f32 %v1857_v3  ;;  %v1842_v20 = vmul.f32 %v1840_v21, %v3467_v35  ;;  %vm1865_vm10 = vweird.f32 %v1857_v3 }
 0x847   : > { %v1848_v23 = vpop.xlane.xlu1 %1847 }
 0x848   : > { %v1852_v24 = vmul.f32 %v1842_v20, %v1842_v20  ;;  %v1850_v25 = vmul.f32 %v1848_v23, %v3467_v35  ;;  %v1856_v41 = vsub.f32 %v1836_v7, %v1842_v20 }
 0x84a   : > { %v1854_v17 = vsub.f32 %v1850_v25, %v1852_v24 }
 0x84c   : > { %v2632_v26 = vpop.eup %2631  ;;  %v1858_v27 = vadd.f32 1e-05, %v1854_v17 }
 0x84d   : > { %v1860_v28 = vmul.f32 %v2632_v26, %v1857_v3  ;;  %vm1866_vm9 = vweird.f32 %v2632_v26 }
 0x84e   : > { %2633 = vrsqrt.f32 %v1858_v27  ;;  %vm1867_vm11 = vmor %vm1865_vm10, %vm1866_vm9  ;;  %vm1875_vm13 = vweird.f32 %v1858_v27 }
 0x84f   : > { %v1861_v29 = vmul.f32 %v2632_v26, %v1860_v28 }
 0x851   : > { %v1862_v30 = vmul.f32 0.5, %v1861_v29 }
 0x853   : > { %v1863_v31 = vsub.f32 1.5, %v1862_v30 }
 0x854   : > { %v2634_v32 = vpop.eup %2633 }
 0x855   : > { %v1864_v36 = vmul.f32 %v2632_v26, %v1863_v31  ;;  %v1870_v37 = vmul.f32 %v2634_v32, %v1858_v27  ;;  %vm1876_vm12 = vweird.f32 %v2634_v32 }
 0x856   : > { %vm1877_vm14 = vmor %vm1875_vm13, %vm1876_vm12 }
 0x857   : > { %v1868_v35 = vsel %vm1867_vm11, %v2632_v26, %v1864_v36  ;;  %v1871_v57 = vmul.f32 %v2634_v32, %v1870_v37 }
 0x858   : > { %v1879_v38 = vmul.f32 %v1868_v35, %v1855_v14 }
 0x859   : > { %v1872_v22 = vmul.f32 0.5, %v1871_v57 }
 0x85a   : > { %v1881_v58 = vmul.f32 %v3482_v10, %v1879_v38 }
 0x85b   : > { %v1873_v39 = vsub.f32 1.5, %v1872_v22 }
 0x85c   : > { %v1883_v40 = vadd.f32 %v3489_v52, %v1881_v58 }
 0x85d   : > { %v1874_v48 = vmul.f32 %v2634_v32, %v1873_v39 }
 0x85e   : > { %1885 = vst [vmem:[%s627_s30] sm:$0xff] %v1883_v40 }
 0x85f   : > { %v1878_v43 = vsel %vm1877_vm14, %v2634_v32, %v1874_v48 }
 0x860   : > { %v1880_v47 = vmul.f32 %v1878_v43, %v1856_v41 }
 0x862   : > { %v1882_v42 = vmul.f32 %v3482_v10, %v1880_v47 }
 0x864   : > { %v1884_v44 = vadd.f32 %v3489_v52, %v1882_v42 }
 0x866   : > { %1886 = vst [vmem:[%s627_s30 + $0x8] sm:$0xff] %v1884_v44 }
 0x867   : > { %2872 = shalt.err (!%p2869_p2)
}
 0x868   : > { %s2995_s16 = smov 128   ;;  %s2996_s2 = smov 8  }
 0x869   : > { %2439 = dma.vmem_to_hbm [thread:$0]  (%p3238_p7), %s1903_s14, 256, %s1905_s8, %s1888_s29, %s2995_s16, %s2995_s16, %s2996_s2  }
 0x86a PF: > { %p2481_p4 = scmp.ge.s32.totalorder %s2979_s28, 2  ;;  %s1919_s5 = sand.u32 1, %s2939_s18  }
 0x86b   : > { %s1920_s24 = scalar_lea.sflag [#allocation4], %s1919_s5 }
 0x86c   : > { %p2465_p5 = pnand %p2481_p4, %p3253_p11 }
 0x86e   : > { %p2466_p10 = pneg %p2465_p5 }
 0x870   : > { %2934 = dma.done.wait (%p2466_p10), %s1920_s24, 256  }
 0x871   : > { %2936 = vsyncadd (%p2466_p10), %s1920_s24, 4294967040  ;;  %s34_s28 = sadd.s32 1, %s2979_s28   ;;  %s3637_s4 = sld [smem:[#allocation21_spill]] }
 0x872   : > { %p31_p6 = scmp.ge.s32.totalorder %s34_s28, 6   ;;  %s3638_s7 = sld [smem:[#allocation22_spill]] }
 0x873   : > { %s3639_s18 = smov %s2943_s19  ;;  %s3640_s19 = smov %s2947_s20 }
 0x874   : > { %s3641_s20 = smov %s3246_s15  ;;  %s3642_s21 = smov %s2955_s22 }
 0x875   : > { %s3643_s22 = smov %s2959_s23  ;;  %s3644_s23 = smov %s3243_s6 }
 0x876   : > { %s3645_s24 = smov %s2971_s26  ;;  %s3646_s25 = smov %s2975_s27 }
 0x877   : > { %s3647_s26 = smov %s3637_s4  ;;  %33 = sbr.rel (!%p31_p6) target bundleno = 28 (0x1c), region = 150 }
 0x878   : > { %s3648_s27 = smov %s3638_s7 }
 0x87c   :  { %1926 = vsyncpa [#allocation3], 1 }
 0x87d   :  { %1928 = vsyncpa [#allocation3 + $0x1], 1 }
 0x87e   :  { %1929 = vsyncpa [#allocation6], 1 }
 0x87f   :  { %1930 = vsyncpa [#allocation9], 1 }
 0x880   :  { %1931 = vsyncpa [#allocation12], 1 }
 0x881   :  { %1932 = vsyncpa [#allocation4], 1 }
 0x882   :  { %1934 = vsyncpa [#allocation4 + $0x1], 1 }

</bundles_post_ra>
